<compile_context>
chip_gen: v7x
topology: tpu7x:2x2x1
jax: 0.10.0
libtpu: 0.0.40
codegen_flags: <defaults>
</compile_context>

<pallas_src>
import jax
import jax.numpy as jnp
import numpy as np
from jax.experimental import pallas as pl
from jax.experimental.pallas import tpu as pltpu

N, C, H, W = 1, 336, 14, 14
KH, KW = 5, 5
PAD = 2
EPS = 1e-3
P = H * W                     # 196 flattened spatial positions (lane axis)

C_BLK = 168                   # channels per grid step (336 = 2 * 168, balanced)
CH = 24                       # channels per in-kernel chunk (multiple of 8)
N_CH = C_BLK // CH            # 7 chunks per grid step
_INV_N = 1.0 / float(P)


def _build_tap_masks():
    """mask[t, p] = 1 iff tap t = kh*KW+kw reads an in-image pixel for output p."""
    p = np.arange(P)
    row, col = p // W, p % W
    m = np.zeros((KH * KW, P), np.float32)
    for kh in range(KH):
        for kw in range(KW):
            dh, dw = kh - PAD, kw - PAD
            ok = (row + dh >= 0) & (row + dh < H) & (col + dw >= 0) & (col + dw < W)
            m[kh * KW + kw] = ok.astype(np.float32)
    return m


_TAP_MASKS = _build_tap_masks()


def _shift_lanes(y, off):
    """t[:, p] = y[:, p + off], zero filled outside [0, P).  y: (CH, P)."""
    if off == 0:
        return y
    ch = y.shape[0]
    z = jnp.zeros((ch, abs(off)), y.dtype)
    if off > 0:
        return jnp.concatenate([y[:, off:], z], axis=1)
    return jnp.concatenate([z, y[:, :P + off]], axis=1)


def _bn_relu_dwconv_bn_kernel(x_ref, w_ref, g1_ref, b1_ref, g2_ref, b2_ref,
                              mask_ref, o_ref):
    # x_ref   : (C_BLK, P)   activations, channels on sublanes / positions on lanes
    # w_ref   : (C_BLK, 25)  depthwise taps, column t = kh*KW + kw
    # g*/b*   : (C_BLK, 1)   BN affine parameters
    # mask_ref: (25, P)      per-tap validity masks (constants)
    # o_ref   : (C_BLK, P)

    def chunk(ci, carry):
        c0 = pl.multiple_of(ci * CH, 8)
        xs = x_ref[pl.ds(c0, CH), :]                      # (CH, P)
        wts = w_ref[pl.ds(c0, CH), :]                     # (CH, 25)
        g1c = g1_ref[pl.ds(c0, CH), :]                    # (CH, 1)
        b1c = b1_ref[pl.ds(c0, CH), :]
        g2c = g2_ref[pl.ds(c0, CH), :]
        b2c = b2_ref[pl.ds(c0, CH), :]

        # ---- BatchNorm #1 (training-mode batch stats, two-pass) + ReLU ----
        m1 = jnp.sum(xs, axis=1, keepdims=True) * _INV_N
        d1 = xs - m1
        v1 = jnp.sum(d1 * d1, axis=1, keepdims=True) * _INV_N
        sc1 = g1c * jax.lax.rsqrt(v1 + EPS)
        y = jnp.maximum(d1 * sc1 + b1c, 0.0)              # (CH, P)

        # ---- depthwise 5x5 conv: 25 taps = lane shift * mask * per-channel w ----
        acc = jnp.zeros((CH, P), jnp.float32)
        for kh in range(KH):
            for kw in range(KW):
                t = kh * KW + kw
                off = (kh - PAD) * W + (kw - PAD)          # source displacement in p
                shifted = _shift_lanes(y, off)
                w_t = wts[:, t:t + 1]                      # (CH, 1), lane-broadcast
                if off == 0:
                    acc = acc + shifted * w_t              # centre tap: mask all-ones
                else:
                    mrow = mask_ref[pl.ds(t, 1), :]        # (1, P), sublane-broadcast
                    acc = acc + (shifted * mrow) * w_t

        # ---- BatchNorm #2 (training-mode batch stats, two-pass) ----
        m2 = jnp.sum(acc, axis=1, keepdims=True) * _INV_N
        d2 = acc - m2
        v2 = jnp.sum(d2 * d2, axis=1, keepdims=True) * _INV_N
        sc2 = g2c * jax.lax.rsqrt(v2 + EPS)
        o_ref[pl.ds(c0, CH), :] = d2 * sc2 + b2c
        return carry

    jax.lax.fori_loop(0, N_CH, chunk, 0)


def fbnet_block(x_nchw, w_dw, g1, b1, g2, b2):
    """x_nchw: (1, 336, 14, 14); w_dw: (336, 1, 5, 5). Returns NCHW output."""
    x2d = x_nchw.reshape(C, P)                 # no transpose: channels stay major
    w2d = w_dw.reshape(C, KH * KW)
    masks = jnp.asarray(_TAP_MASKS)

    cost = pl.CostEstimate(
        flops=2 * P * C * KH * KW + 12 * P * C,
        transcendentals=2 * C,
        bytes_accessed=(2 * P * C + KH * KW * C + 4 * C + KH * KW * P) * 4)

    out2d = pl.pallas_call(
        _bn_relu_dwconv_bn_kernel,
        out_shape=jax.ShapeDtypeStruct((C, P), jnp.float32),
        grid=(C // C_BLK,),
        in_specs=[
            pl.BlockSpec((C_BLK, P), lambda i: (i, 0)),          # x
            pl.BlockSpec((C_BLK, KH * KW), lambda i: (i, 0)),    # dw weights
            pl.BlockSpec((C_BLK, 1), lambda i: (i, 0)),          # gamma1
            pl.BlockSpec((C_BLK, 1), lambda i: (i, 0)),          # beta1
            pl.BlockSpec((C_BLK, 1), lambda i: (i, 0)),          # gamma2
            pl.BlockSpec((C_BLK, 1), lambda i: (i, 0)),          # beta2
            pl.BlockSpec((KH * KW, P), lambda i: (0, 0)),        # tap masks
        ],
        out_specs=pl.BlockSpec((C_BLK, P), lambda i: (i, 0)),
        compiler_params=pltpu.CompilerParams(
            dimension_semantics=("parallel",)),
        cost_estimate=cost,
    )(x2d, w2d,
      g1.reshape(C, 1), b1.reshape(C, 1),
      g2.reshape(C, 1), b2.reshape(C, 1),
      masks)

    return out2d.reshape(N, C, H, W)


def reference(x, w_dw, g1, b1, g2, b2):
    """Pure-JAX reference of the PyTorch forward (training-mode BN)."""
    m1 = jnp.mean(x, axis=(0, 2, 3), keepdims=True)
    v1 = jnp.var(x, axis=(0, 2, 3), keepdims=True)
    y = (x - m1) / jnp.sqrt(v1 + EPS) * g1.reshape(1, C, 1, 1) + b1.reshape(1, C, 1, 1)
    y = jnp.maximum(y, 0.0)
    z = jax.lax.conv_general_dilated(
        y, w_dw, window_strides=(1, 1), padding=((PAD, PAD), (PAD, PAD)),
        feature_group_count=C, dimension_numbers=("NCHW", "OIHW", "NCHW"),
        precision=jax.lax.Precision.HIGHEST)
    m2 = jnp.mean(z, axis=(0, 2, 3), keepdims=True)
    v2 = jnp.var(z, axis=(0, 2, 3), keepdims=True)
    return (z - m2) / jnp.sqrt(v2 + EPS) * g2.reshape(1, C, 1, 1) + b2.reshape(1, C, 1, 1)


if __name__ == "__main__":
    key = jax.random.PRNGKey(0)
    kx, kw, k1, k2, k3, k4 = jax.random.split(key, 6)

    x = jax.random.normal(kx, (N, C, H, W), dtype=jnp.float32)
    w_dw = jax.random.normal(kw, (C, 1, KH, KW), dtype=jnp.float32) * 0.1
    gamma1 = 1.0 + 0.1 * jax.random.normal(k1, (C,), dtype=jnp.float32)
    beta1 = 0.1 * jax.random.normal(k2, (C,), dtype=jnp.float32)
    gamma2 = 1.0 + 0.1 * jax.random.normal(k3, (C,), dtype=jnp.float32)
    beta2 = 0.1 * jax.random.normal(k4, (C,), dtype=jnp.float32)

    fb = jax.jit(fbnet_block)
    out = fb(x, w_dw, gamma1, beta1, gamma2, beta2)
    out = jax.block_until_ready(out)

    ref = reference(x, w_dw, gamma1, beta1, gamma2, beta2)
    assert out.shape == (N, C, H, W)
    assert jnp.allclose(out, ref, atol=2e-3, rtol=2e-3), float(jnp.max(jnp.abs(out - ref)))

    print("KERNEL_OK")
</pallas_src>

<mosaic_0001>
module attributes {stable_mosaic.version = 11 : i64} {
  func.func @_bn_relu_dwconv_bn_kernel(%arg0: i32, %arg1: memref<168x196xf32, #tpu.memory_space<vmem>>, %arg2: memref<168x25xf32, #tpu.memory_space<vmem>>, %arg3: memref<168x1xf32, #tpu.memory_space<vmem>>, %arg4: memref<168x1xf32, #tpu.memory_space<vmem>>, %arg5: memref<168x1xf32, #tpu.memory_space<vmem>>, %arg6: memref<168x1xf32, #tpu.memory_space<vmem>>, %arg7: memref<25x196xf32, #tpu.memory_space<vmem>>, %arg8: memref<168x196xf32, #tpu.memory_space<vmem>>) attributes {dimension_semantics = [#tpu.dimension_semantics<parallel>], iteration_bounds = array<i64: 2>, scalar_prefetch = 0 : i64, scratch_operands = 0 : i64, tpu.core_type = #tpu.core_type<tc>, window_params = [{transform_indices = @transform_0, window_bounds = array<i64: 168, 196>}, {transform_indices = @transform_1, window_bounds = array<i64: 168, 25>}, {transform_indices = @transform_2, window_bounds = array<i64: 168, 1>}, {transform_indices = @transform_3, window_bounds = array<i64: 168, 1>}, {transform_indices = @transform_4, window_bounds = array<i64: 168, 1>}, {transform_indices = @transform_5, window_bounds = array<i64: 168, 1>}, {pipeline_mode = #tpu.pipeline_mode<synchronous>, transform_indices = @transform_6, window_bounds = array<i64: 25, 196>}, {transform_indices = @transform_7, window_bounds = array<i64: 168, 196>}]} {
    %c0_i32 = arith.constant 0 : i32
    %c7_i32 = arith.constant 7 : i32
    %0 = arith.addi %c0_i32, %c7_i32 : i32
    %c1_i32 = arith.constant 1 : i32
    scf.for %arg9 = %c0_i32 to %0 step %c1_i32  : i32 {
      %c24_i32 = arith.constant 24 : i32
      %1 = arith.muli %arg9, %c24_i32 : i32
      %2 = tpu.assume_multiple %1, 8 : i32
      %3 = arith.index_cast %2 : i32 to index
      %c0 = arith.constant 0 : index
      %4 = vector.load %arg1[%3, %c0] : memref<168x196xf32, #tpu.memory_space<vmem>>, vector<24x196xf32>
      %5 = arith.index_cast %2 : i32 to index
      %c0_1 = arith.constant 0 : index
      %6 = vector.load %arg2[%5, %c0_1] : memref<168x25xf32, #tpu.memory_space<vmem>>, vector<24x25xf32>
      %7 = arith.index_cast %2 : i32 to index
      %c0_2 = arith.constant 0 : index
      %8 = vector.load %arg3[%7, %c0_2] : memref<168x1xf32, #tpu.memory_space<vmem>>, vector<24x1xf32>
      %9 = arith.index_cast %2 : i32 to index
      %c0_3 = arith.constant 0 : index
      %10 = vector.load %arg4[%9, %c0_3] : memref<168x1xf32, #tpu.memory_space<vmem>>, vector<24x1xf32>
      %11 = arith.index_cast %2 : i32 to index
      %c0_4 = arith.constant 0 : index
      %12 = vector.load %arg5[%11, %c0_4] : memref<168x1xf32, #tpu.memory_space<vmem>>, vector<24x1xf32>
      %13 = arith.index_cast %2 : i32 to index
      %c0_5 = arith.constant 0 : index
      %14 = vector.load %arg6[%13, %c0_5] : memref<168x1xf32, #tpu.memory_space<vmem>>, vector<24x1xf32>
      %cst = arith.constant dense<0.000000e+00> : vector<24xf32>
      %15 = vector.multi_reduction <add>, %4, %cst [1] : vector<24x196xf32> to vector<24xf32>
      %16 = vector.shape_cast %15 : vector<24xf32> to vector<24x1xf32>
      %cst_6 = arith.constant 0.00510204071 : f32
      %17 = vector.broadcast %cst_6 : f32 to vector<24x1xf32>
      %18 = arith.mulf %16, %17 : vector<24x1xf32>
      %19 = vector.broadcast %18 : vector<24x1xf32> to vector<24x196xf32>
      %20 = arith.subf %4, %19 : vector<24x196xf32>
      %21 = arith.mulf %20, %20 : vector<24x196xf32>
      %cst_7 = arith.constant dense<0.000000e+00> : vector<24xf32>
      %22 = vector.multi_reduction <add>, %21, %cst_7 [1] : vector<24x196xf32> to vector<24xf32>
      %23 = vector.shape_cast %22 : vector<24xf32> to vector<24x1xf32>
      %cst_8 = arith.constant 0.00510204071 : f32
      %24 = vector.broadcast %cst_8 : f32 to vector<24x1xf32>
      %25 = arith.mulf %23, %24 : vector<24x1xf32>
      %cst_9 = arith.constant 1.000000e-03 : f32
      %26 = vector.broadcast %cst_9 : f32 to vector<24x1xf32>
      %27 = arith.addf %25, %26 : vector<24x1xf32>
      %28 = math.rsqrt %27 : vector<24x1xf32>
      %29 = arith.mulf %8, %28 : vector<24x1xf32>
      %30 = vector.broadcast %29 : vector<24x1xf32> to vector<24x196xf32>
      %31 = arith.mulf %20, %30 : vector<24x196xf32>
      %32 = vector.broadcast %10 : vector<24x1xf32> to vector<24x196xf32>
      %33 = arith.addf %31, %32 : vector<24x196xf32>
      %cst_10 = arith.constant 0.000000e+00 : f32
      %34 = vector.broadcast %cst_10 : f32 to vector<24x196xf32>
      %35 = arith.maximumf %33, %34 : vector<24x196xf32>
      %cst_11 = arith.constant 0.000000e+00 : f32
      %36 = vector.broadcast %cst_11 : f32 to vector<24x196xf32>
      %cst_12 = arith.constant 0.000000e+00 : f32
      %37 = vector.broadcast %cst_12 : f32 to vector<24x30xf32>
      %38 = vector.extract_strided_slice %35 {offsets = [0, 0], sizes = [24, 166], strides = [1, 1]} : vector<24x196xf32> to vector<24x166xf32>
      %39 = tpu.concatenate %37, %38 in 1 : vector<24x30xf32>, vector<24x166xf32> -> vector<24x196xf32>
      %40 = vector.extract_strided_slice %6 {offsets = [0, 0], sizes = [24, 1], strides = [1, 1]} : vector<24x25xf32> to vector<24x1xf32>
      %c0_13 = arith.constant 0 : index
      %c0_14 = arith.constant 0 : index
      %41 = vector.load %arg7[%c0_13, %c0_14] : memref<25x196xf32, #tpu.memory_space<vmem>>, vector<1x196xf32>
      %42 = vector.broadcast %41 : vector<1x196xf32> to vector<24x196xf32>
      %43 = arith.mulf %39, %42 : vector<24x196xf32>
      %44 = vector.broadcast %40 : vector<24x1xf32> to vector<24x196xf32>
      %45 = arith.mulf %43, %44 : vector<24x196xf32>
      %46 = arith.addf %36, %45 : vector<24x196xf32>
      %cst_15 = arith.constant 0.000000e+00 : f32
      %47 = vector.broadcast %cst_15 : f32 to vector<24x29xf32>
      %48 = vector.extract_strided_slice %35 {offsets = [0, 0], sizes = [24, 167], strides = [1, 1]} : vector<24x196xf32> to vector<24x167xf32>
      %49 = tpu.concatenate %47, %48 in 1 : vector<24x29xf32>, vector<24x167xf32> -> vector<24x196xf32>
      %50 = vector.extract_strided_slice %6 {offsets = [0, 1], sizes = [24, 1], strides = [1, 1]} : vector<24x25xf32> to vector<24x1xf32>
      %c1 = arith.constant 1 : index
      %c0_16 = arith.constant 0 : index
      %51 = vector.load %arg7[%c1, %c0_16] : memref<25x196xf32, #tpu.memory_space<vmem>>, vector<1x196xf32>
      %52 = vector.broadcast %51 : vector<1x196xf32> to vector<24x196xf32>
      %53 = arith.mulf %49, %52 : vector<24x196xf32>
      %54 = vector.broadcast %50 : vector<24x1xf32> to vector<24x196xf32>
      %55 = arith.mulf %53, %54 : vector<24x196xf32>
      %56 = arith.addf %46, %55 : vector<24x196xf32>
      %cst_17 = arith.constant 0.000000e+00 : f32
      %57 = vector.broadcast %cst_17 : f32 to vector<24x28xf32>
      %58 = vector.extract_strided_slice %35 {offsets = [0, 0], sizes = [24, 168], strides = [1, 1]} : vector<24x196xf32> to vector<24x168xf32>
      %59 = tpu.concatenate %57, %58 in 1 : vector<24x28xf32>, vector<24x168xf32> -> vector<24x196xf32>
      %60 = vector.extract_strided_slice %6 {offsets = [0, 2], sizes = [24, 1], strides = [1, 1]} : vector<24x25xf32> to vector<24x1xf32>
      %c2 = arith.constant 2 : index
      %c0_18 = arith.constant 0 : index
      %61 = vector.load %arg7[%c2, %c0_18] : memref<25x196xf32, #tpu.memory_space<vmem>>, vector<1x196xf32>
      %62 = vector.broadcast %61 : vector<1x196xf32> to vector<24x196xf32>
      %63 = arith.mulf %59, %62 : vector<24x196xf32>
      %64 = vector.broadcast %60 : vector<24x1xf32> to vector<24x196xf32>
      %65 = arith.mulf %63, %64 : vector<24x196xf32>
      %66 = arith.addf %56, %65 : vector<24x196xf32>
      %cst_19 = arith.constant 0.000000e+00 : f32
      %67 = vector.broadcast %cst_19 : f32 to vector<24x27xf32>
      %68 = vector.extract_strided_slice %35 {offsets = [0, 0], sizes = [24, 169], strides = [1, 1]} : vector<24x196xf32> to vector<24x169xf32>
      %69 = tpu.concatenate %67, %68 in 1 : vector<24x27xf32>, vector<24x169xf32> -> vector<24x196xf32>
      %70 = vector.extract_strided_slice %6 {offsets = [0, 3], sizes = [24, 1], strides = [1, 1]} : vector<24x25xf32> to vector<24x1xf32>
      %c3 = arith.constant 3 : index
      %c0_20 = arith.constant 0 : index
      %71 = vector.load %arg7[%c3, %c0_20] : memref<25x196xf32, #tpu.memory_space<vmem>>, vector<1x196xf32>
      %72 = vector.broadcast %71 : vector<1x196xf32> to vector<24x196xf32>
      %73 = arith.mulf %69, %72 : vector<24x196xf32>
      %74 = vector.broadcast %70 : vector<24x1xf32> to vector<24x196xf32>
      %75 = arith.mulf %73, %74 : vector<24x196xf32>
      %76 = arith.addf %66, %75 : vector<24x196xf32>
      %cst_21 = arith.constant 0.000000e+00 : f32
      %77 = vector.broadcast %cst_21 : f32 to vector<24x26xf32>
      %78 = vector.extract_strided_slice %35 {offsets = [0, 0], sizes = [24, 170], strides = [1, 1]} : vector<24x196xf32> to vector<24x170xf32>
      %79 = tpu.concatenate %77, %78 in 1 : vector<24x26xf32>, vector<24x170xf32> -> vector<24x196xf32>
      %80 = vector.extract_strided_slice %6 {offsets = [0, 4], sizes = [24, 1], strides = [1, 1]} : vector<24x25xf32> to vector<24x1xf32>
      %c4 = arith.constant 4 : index
      %c0_22 = arith.constant 0 : index
      %81 = vector.load %arg7[%c4, %c0_22] : memref<25x196xf32, #tpu.memory_space<vmem>>, vector<1x196xf32>
      %82 = vector.broadcast %81 : vector<1x196xf32> to vector<24x196xf32>
      %83 = arith.mulf %79, %82 : vector<24x196xf32>
      %84 = vector.broadcast %80 : vector<24x1xf32> to vector<24x196xf32>
      %85 = arith.mulf %83, %84 : vector<24x196xf32>
      %86 = arith.addf %76, %85 : vector<24x196xf32>
      %cst_23 = arith.constant 0.000000e+00 : f32
      %87 = vector.broadcast %cst_23 : f32 to vector<24x16xf32>
      %88 = vector.extract_strided_slice %35 {offsets = [0, 0], sizes = [24, 180], strides = [1, 1]} : vector<24x196xf32> to vector<24x180xf32>
      %89 = tpu.concatenate %87, %88 in 1 : vector<24x16xf32>, vector<24x180xf32> -> vector<24x196xf32>
      %90 = vector.extract_strided_slice %6 {offsets = [0, 5], sizes = [24, 1], strides = [1, 1]} : vector<24x25xf32> to vector<24x1xf32>
      %c5 = arith.constant 5 : index
      %c0_24 = arith.constant 0 : index
      %91 = vector.load %arg7[%c5, %c0_24] : memref<25x196xf32, #tpu.memory_space<vmem>>, vector<1x196xf32>
      %92 = vector.broadcast %91 : vector<1x196xf32> to vector<24x196xf32>
      %93 = arith.mulf %89, %92 : vector<24x196xf32>
      %94 = vector.broadcast %90 : vector<24x1xf32> to vector<24x196xf32>
      %95 = arith.mulf %93, %94 : vector<24x196xf32>
      %96 = arith.addf %86, %95 : vector<24x196xf32>
      %cst_25 = arith.constant 0.000000e+00 : f32
      %97 = vector.broadcast %cst_25 : f32 to vector<24x15xf32>
      %98 = vector.extract_strided_slice %35 {offsets = [0, 0], sizes = [24, 181], strides = [1, 1]} : vector<24x196xf32> to vector<24x181xf32>
      %99 = tpu.concatenate %97, %98 in 1 : vector<24x15xf32>, vector<24x181xf32> -> vector<24x196xf32>
      %100 = vector.extract_strided_slice %6 {offsets = [0, 6], sizes = [24, 1], strides = [1, 1]} : vector<24x25xf32> to vector<24x1xf32>
      %c6 = arith.constant 6 : index
      %c0_26 = arith.constant 0 : index
      %101 = vector.load %arg7[%c6, %c0_26] : memref<25x196xf32, #tpu.memory_space<vmem>>, vector<1x196xf32>
      %102 = vector.broadcast %101 : vector<1x196xf32> to vector<24x196xf32>
      %103 = arith.mulf %99, %102 : vector<24x196xf32>
      %104 = vector.broadcast %100 : vector<24x1xf32> to vector<24x196xf32>
      %105 = arith.mulf %103, %104 : vector<24x196xf32>
      %106 = arith.addf %96, %105 : vector<24x196xf32>
      %cst_27 = arith.constant 0.000000e+00 : f32
      %107 = vector.broadcast %cst_27 : f32 to vector<24x14xf32>
      %108 = vector.extract_strided_slice %35 {offsets = [0, 0], sizes = [24, 182], strides = [1, 1]} : vector<24x196xf32> to vector<24x182xf32>
      %109 = tpu.concatenate %107, %108 in 1 : vector<24x14xf32>, vector<24x182xf32> -> vector<24x196xf32>
      %110 = vector.extract_strided_slice %6 {offsets = [0, 7], sizes = [24, 1], strides = [1, 1]} : vector<24x25xf32> to vector<24x1xf32>
      %c7 = arith.constant 7 : index
      %c0_28 = arith.constant 0 : index
      %111 = vector.load %arg7[%c7, %c0_28] : memref<25x196xf32, #tpu.memory_space<vmem>>, vector<1x196xf32>
      %112 = vector.broadcast %111 : vector<1x196xf32> to vector<24x196xf32>
      %113 = arith.mulf %109, %112 : vector<24x196xf32>
      %114 = vector.broadcast %110 : vector<24x1xf32> to vector<24x196xf32>
      %115 = arith.mulf %113, %114 : vector<24x196xf32>
      %116 = arith.addf %106, %115 : vector<24x196xf32>
      %cst_29 = arith.constant 0.000000e+00 : f32
      %117 = vector.broadcast %cst_29 : f32 to vector<24x13xf32>
      %118 = vector.extract_strided_slice %35 {offsets = [0, 0], sizes = [24, 183], strides = [1, 1]} : vector<24x196xf32> to vector<24x183xf32>
      %119 = tpu.concatenate %117, %118 in 1 : vector<24x13xf32>, vector<24x183xf32> -> vector<24x196xf32>
      %120 = vector.extract_strided_slice %6 {offsets = [0, 8], sizes = [24, 1], strides = [1, 1]} : vector<24x25xf32> to vector<24x1xf32>
      %c8 = arith.constant 8 : index
      %c0_30 = arith.constant 0 : index
      %121 = vector.load %arg7[%c8, %c0_30] : memref<25x196xf32, #tpu.memory_space<vmem>>, vector<1x196xf32>
      %122 = vector.broadcast %121 : vector<1x196xf32> to vector<24x196xf32>
      %123 = arith.mulf %119, %122 : vector<24x196xf32>
      %124 = vector.broadcast %120 : vector<24x1xf32> to vector<24x196xf32>
      %125 = arith.mulf %123, %124 : vector<24x196xf32>
      %126 = arith.addf %116, %125 : vector<24x196xf32>
      %cst_31 = arith.constant 0.000000e+00 : f32
      %127 = vector.broadcast %cst_31 : f32 to vector<24x12xf32>
      %128 = vector.extract_strided_slice %35 {offsets = [0, 0], sizes = [24, 184], strides = [1, 1]} : vector<24x196xf32> to vector<24x184xf32>
      %129 = tpu.concatenate %127, %128 in 1 : vector<24x12xf32>, vector<24x184xf32> -> vector<24x196xf32>
      %130 = vector.extract_strided_slice %6 {offsets = [0, 9], sizes = [24, 1], strides = [1, 1]} : vector<24x25xf32> to vector<24x1xf32>
      %c9 = arith.constant 9 : index
      %c0_32 = arith.constant 0 : index
      %131 = vector.load %arg7[%c9, %c0_32] : memref<25x196xf32, #tpu.memory_space<vmem>>, vector<1x196xf32>
      %132 = vector.broadcast %131 : vector<1x196xf32> to vector<24x196xf32>
      %133 = arith.mulf %129, %132 : vector<24x196xf32>
      %134 = vector.broadcast %130 : vector<24x1xf32> to vector<24x196xf32>
      %135 = arith.mulf %133, %134 : vector<24x196xf32>
      %136 = arith.addf %126, %135 : vector<24x196xf32>
      %cst_33 = arith.constant 0.000000e+00 : f32
      %137 = vector.broadcast %cst_33 : f32 to vector<24x2xf32>
      %138 = vector.extract_strided_slice %35 {offsets = [0, 0], sizes = [24, 194], strides = [1, 1]} : vector<24x196xf32> to vector<24x194xf32>
      %139 = tpu.concatenate %137, %138 in 1 : vector<24x2xf32>, vector<24x194xf32> -> vector<24x196xf32>
      %140 = vector.extract_strided_slice %6 {offsets = [0, 10], sizes = [24, 1], strides = [1, 1]} : vector<24x25xf32> to vector<24x1xf32>
      %c10 = arith.constant 10 : index
      %c0_34 = arith.constant 0 : index
      %141 = vector.load %arg7[%c10, %c0_34] : memref<25x196xf32, #tpu.memory_space<vmem>>, vector<1x196xf32>
      %142 = vector.broadcast %141 : vector<1x196xf32> to vector<24x196xf32>
      %143 = arith.mulf %139, %142 : vector<24x196xf32>
      %144 = vector.broadcast %140 : vector<24x1xf32> to vector<24x196xf32>
      %145 = arith.mulf %143, %144 : vector<24x196xf32>
      %146 = arith.addf %136, %145 : vector<24x196xf32>
      %cst_35 = arith.constant 0.000000e+00 : f32
      %147 = vector.broadcast %cst_35 : f32 to vector<24x1xf32>
      %148 = vector.extract_strided_slice %35 {offsets = [0, 0], sizes = [24, 195], strides = [1, 1]} : vector<24x196xf32> to vector<24x195xf32>
      %149 = tpu.concatenate %147, %148 in 1 : vector<24x1xf32>, vector<24x195xf32> -> vector<24x196xf32>
      %150 = vector.extract_strided_slice %6 {offsets = [0, 11], sizes = [24, 1], strides = [1, 1]} : vector<24x25xf32> to vector<24x1xf32>
      %c11 = arith.constant 11 : index
      %c0_36 = arith.constant 0 : index
      %151 = vector.load %arg7[%c11, %c0_36] : memref<25x196xf32, #tpu.memory_space<vmem>>, vector<1x196xf32>
      %152 = vector.broadcast %151 : vector<1x196xf32> to vector<24x196xf32>
      %153 = arith.mulf %149, %152 : vector<24x196xf32>
      %154 = vector.broadcast %150 : vector<24x1xf32> to vector<24x196xf32>
      %155 = arith.mulf %153, %154 : vector<24x196xf32>
      %156 = arith.addf %146, %155 : vector<24x196xf32>
      %157 = vector.extract_strided_slice %6 {offsets = [0, 12], sizes = [24, 1], strides = [1, 1]} : vector<24x25xf32> to vector<24x1xf32>
      %158 = vector.broadcast %157 : vector<24x1xf32> to vector<24x196xf32>
      %159 = arith.mulf %35, %158 : vector<24x196xf32>
      %160 = arith.addf %156, %159 : vector<24x196xf32>
      %cst_37 = arith.constant 0.000000e+00 : f32
      %161 = vector.broadcast %cst_37 : f32 to vector<24x1xf32>
      %162 = vector.extract_strided_slice %35 {offsets = [0, 1], sizes = [24, 195], strides = [1, 1]} : vector<24x196xf32> to vector<24x195xf32>
      %163 = tpu.concatenate %162, %161 in 1 : vector<24x195xf32>, vector<24x1xf32> -> vector<24x196xf32>
      %164 = vector.extract_strided_slice %6 {offsets = [0, 13], sizes = [24, 1], strides = [1, 1]} : vector<24x25xf32> to vector<24x1xf32>
      %c13 = arith.constant 13 : index
      %c0_38 = arith.constant 0 : index
      %165 = vector.load %arg7[%c13, %c0_38] : memref<25x196xf32, #tpu.memory_space<vmem>>, vector<1x196xf32>
      %166 = vector.broadcast %165 : vector<1x196xf32> to vector<24x196xf32>
      %167 = arith.mulf %163, %166 : vector<24x196xf32>
      %168 = vector.broadcast %164 : vector<24x1xf32> to vector<24x196xf32>
      %169 = arith.mulf %167, %168 : vector<24x196xf32>
      %170 = arith.addf %160, %169 : vector<24x196xf32>
      %cst_39 = arith.constant 0.000000e+00 : f32
      %171 = vector.broadcast %cst_39 : f32 to vector<24x2xf32>
      %172 = vector.extract_strided_slice %35 {offsets = [0, 2], sizes = [24, 194], strides = [1, 1]} : vector<24x196xf32> to vector<24x194xf32>
      %173 = tpu.concatenate %172, %171 in 1 : vector<24x194xf32>, vector<24x2xf32> -> vector<24x196xf32>
      %174 = vector.extract_strided_slice %6 {offsets = [0, 14], sizes = [24, 1], strides = [1, 1]} : vector<24x25xf32> to vector<24x1xf32>
      %c14 = arith.constant 14 : index
      %c0_40 = arith.constant 0 : index
      %175 = vector.load %arg7[%c14, %c0_40] : memref<25x196xf32, #tpu.memory_space<vmem>>, vector<1x196xf32>
      %176 = vector.broadcast %175 : vector<1x196xf32> to vector<24x196xf32>
      %177 = arith.mulf %173, %176 : vector<24x196xf32>
      %178 = vector.broadcast %174 : vector<24x1xf32> to vector<24x196xf32>
      %179 = arith.mulf %177, %178 : vector<24x196xf32>
      %180 = arith.addf %170, %179 : vector<24x196xf32>
      %cst_41 = arith.constant 0.000000e+00 : f32
      %181 = vector.broadcast %cst_41 : f32 to vector<24x12xf32>
      %182 = vector.extract_strided_slice %35 {offsets = [0, 12], sizes = [24, 184], strides = [1, 1]} : vector<24x196xf32> to vector<24x184xf32>
      %183 = tpu.concatenate %182, %181 in 1 : vector<24x184xf32>, vector<24x12xf32> -> vector<24x196xf32>
      %184 = vector.extract_strided_slice %6 {offsets = [0, 15], sizes = [24, 1], strides = [1, 1]} : vector<24x25xf32> to vector<24x1xf32>
      %c15 = arith.constant 15 : index
      %c0_42 = arith.constant 0 : index
      %185 = vector.load %arg7[%c15, %c0_42] : memref<25x196xf32, #tpu.memory_space<vmem>>, vector<1x196xf32>
      %186 = vector.broadcast %185 : vector<1x196xf32> to vector<24x196xf32>
      %187 = arith.mulf %183, %186 : vector<24x196xf32>
      %188 = vector.broadcast %184 : vector<24x1xf32> to vector<24x196xf32>
      %189 = arith.mulf %187, %188 : vector<24x196xf32>
      %190 = arith.addf %180, %189 : vector<24x196xf32>
      %cst_43 = arith.constant 0.000000e+00 : f32
      %191 = vector.broadcast %cst_43 : f32 to vector<24x13xf32>
      %192 = vector.extract_strided_slice %35 {offsets = [0, 13], sizes = [24, 183], strides = [1, 1]} : vector<24x196xf32> to vector<24x183xf32>
      %193 = tpu.concatenate %192, %191 in 1 : vector<24x183xf32>, vector<24x13xf32> -> vector<24x196xf32>
      %194 = vector.extract_strided_slice %6 {offsets = [0, 16], sizes = [24, 1], strides = [1, 1]} : vector<24x25xf32> to vector<24x1xf32>
      %c16 = arith.constant 16 : index
      %c0_44 = arith.constant 0 : index
      %195 = vector.load %arg7[%c16, %c0_44] : memref<25x196xf32, #tpu.memory_space<vmem>>, vector<1x196xf32>
      %196 = vector.broadcast %195 : vector<1x196xf32> to vector<24x196xf32>
      %197 = arith.mulf %193, %196 : vector<24x196xf32>
      %198 = vector.broadcast %194 : vector<24x1xf32> to vector<24x196xf32>
      %199 = arith.mulf %197, %198 : vector<24x196xf32>
      %200 = arith.addf %190, %199 : vector<24x196xf32>
      %cst_45 = arith.constant 0.000000e+00 : f32
      %201 = vector.broadcast %cst_45 : f32 to vector<24x14xf32>
      %202 = vector.extract_strided_slice %35 {offsets = [0, 14], sizes = [24, 182], strides = [1, 1]} : vector<24x196xf32> to vector<24x182xf32>
      %203 = tpu.concatenate %202, %201 in 1 : vector<24x182xf32>, vector<24x14xf32> -> vector<24x196xf32>
      %204 = vector.extract_strided_slice %6 {offsets = [0, 17], sizes = [24, 1], strides = [1, 1]} : vector<24x25xf32> to vector<24x1xf32>
      %c17 = arith.constant 17 : index
      %c0_46 = arith.constant 0 : index
      %205 = vector.load %arg7[%c17, %c0_46] : memref<25x196xf32, #tpu.memory_space<vmem>>, vector<1x196xf32>
      %206 = vector.broadcast %205 : vector<1x196xf32> to vector<24x196xf32>
      %207 = arith.mulf %203, %206 : vector<24x196xf32>
      %208 = vector.broadcast %204 : vector<24x1xf32> to vector<24x196xf32>
      %209 = arith.mulf %207, %208 : vector<24x196xf32>
      %210 = arith.addf %200, %209 : vector<24x196xf32>
      %cst_47 = arith.constant 0.000000e+00 : f32
      %211 = vector.broadcast %cst_47 : f32 to vector<24x15xf32>
      %212 = vector.extract_strided_slice %35 {offsets = [0, 15], sizes = [24, 181], strides = [1, 1]} : vector<24x196xf32> to vector<24x181xf32>
      %213 = tpu.concatenate %212, %211 in 1 : vector<24x181xf32>, vector<24x15xf32> -> vector<24x196xf32>
      %214 = vector.extract_strided_slice %6 {offsets = [0, 18], sizes = [24, 1], strides = [1, 1]} : vector<24x25xf32> to vector<24x1xf32>
      %c18 = arith.constant 18 : index
      %c0_48 = arith.constant 0 : index
      %215 = vector.load %arg7[%c18, %c0_48] : memref<25x196xf32, #tpu.memory_space<vmem>>, vector<1x196xf32>
      %216 = vector.broadcast %215 : vector<1x196xf32> to vector<24x196xf32>
      %217 = arith.mulf %213, %216 : vector<24x196xf32>
      %218 = vector.broadcast %214 : vector<24x1xf32> to vector<24x196xf32>
      %219 = arith.mulf %217, %218 : vector<24x196xf32>
      %220 = arith.addf %210, %219 : vector<24x196xf32>
      %cst_49 = arith.constant 0.000000e+00 : f32
      %221 = vector.broadcast %cst_49 : f32 to vector<24x16xf32>
      %222 = vector.extract_strided_slice %35 {offsets = [0, 16], sizes = [24, 180], strides = [1, 1]} : vector<24x196xf32> to vector<24x180xf32>
      %223 = tpu.concatenate %222, %221 in 1 : vector<24x180xf32>, vector<24x16xf32> -> vector<24x196xf32>
      %224 = vector.extract_strided_slice %6 {offsets = [0, 19], sizes = [24, 1], strides = [1, 1]} : vector<24x25xf32> to vector<24x1xf32>
      %c19 = arith.constant 19 : index
      %c0_50 = arith.constant 0 : index
      %225 = vector.load %arg7[%c19, %c0_50] : memref<25x196xf32, #tpu.memory_space<vmem>>, vector<1x196xf32>
      %226 = vector.broadcast %225 : vector<1x196xf32> to vector<24x196xf32>
      %227 = arith.mulf %223, %226 : vector<24x196xf32>
      %228 = vector.broadcast %224 : vector<24x1xf32> to vector<24x196xf32>
      %229 = arith.mulf %227, %228 : vector<24x196xf32>
      %230 = arith.addf %220, %229 : vector<24x196xf32>
      %cst_51 = arith.constant 0.000000e+00 : f32
      %231 = vector.broadcast %cst_51 : f32 to vector<24x26xf32>
      %232 = vector.extract_strided_slice %35 {offsets = [0, 26], sizes = [24, 170], strides = [1, 1]} : vector<24x196xf32> to vector<24x170xf32>
      %233 = tpu.concatenate %232, %231 in 1 : vector<24x170xf32>, vector<24x26xf32> -> vector<24x196xf32>
      %234 = vector.extract_strided_slice %6 {offsets = [0, 20], sizes = [24, 1], strides = [1, 1]} : vector<24x25xf32> to vector<24x1xf32>
      %c20 = arith.constant 20 : index
      %c0_52 = arith.constant 0 : index
      %235 = vector.load %arg7[%c20, %c0_52] : memref<25x196xf32, #tpu.memory_space<vmem>>, vector<1x196xf32>
      %236 = vector.broadcast %235 : vector<1x196xf32> to vector<24x196xf32>
      %237 = arith.mulf %233, %236 : vector<24x196xf32>
      %238 = vector.broadcast %234 : vector<24x1xf32> to vector<24x196xf32>
      %239 = arith.mulf %237, %238 : vector<24x196xf32>
      %240 = arith.addf %230, %239 : vector<24x196xf32>
      %cst_53 = arith.constant 0.000000e+00 : f32
      %241 = vector.broadcast %cst_53 : f32 to vector<24x27xf32>
      %242 = vector.extract_strided_slice %35 {offsets = [0, 27], sizes = [24, 169], strides = [1, 1]} : vector<24x196xf32> to vector<24x169xf32>
      %243 = tpu.concatenate %242, %241 in 1 : vector<24x169xf32>, vector<24x27xf32> -> vector<24x196xf32>
      %244 = vector.extract_strided_slice %6 {offsets = [0, 21], sizes = [24, 1], strides = [1, 1]} : vector<24x25xf32> to vector<24x1xf32>
      %c21 = arith.constant 21 : index
      %c0_54 = arith.constant 0 : index
      %245 = vector.load %arg7[%c21, %c0_54] : memref<25x196xf32, #tpu.memory_space<vmem>>, vector<1x196xf32>
      %246 = vector.broadcast %245 : vector<1x196xf32> to vector<24x196xf32>
      %247 = arith.mulf %243, %246 : vector<24x196xf32>
      %248 = vector.broadcast %244 : vector<24x1xf32> to vector<24x196xf32>
      %249 = arith.mulf %247, %248 : vector<24x196xf32>
      %250 = arith.addf %240, %249 : vector<24x196xf32>
      %cst_55 = arith.constant 0.000000e+00 : f32
      %251 = vector.broadcast %cst_55 : f32 to vector<24x28xf32>
      %252 = vector.extract_strided_slice %35 {offsets = [0, 28], sizes = [24, 168], strides = [1, 1]} : vector<24x196xf32> to vector<24x168xf32>
      %253 = tpu.concatenate %252, %251 in 1 : vector<24x168xf32>, vector<24x28xf32> -> vector<24x196xf32>
      %254 = vector.extract_strided_slice %6 {offsets = [0, 22], sizes = [24, 1], strides = [1, 1]} : vector<24x25xf32> to vector<24x1xf32>
      %c22 = arith.constant 22 : index
      %c0_56 = arith.constant 0 : index
      %255 = vector.load %arg7[%c22, %c0_56] : memref<25x196xf32, #tpu.memory_space<vmem>>, vector<1x196xf32>
      %256 = vector.broadcast %255 : vector<1x196xf32> to vector<24x196xf32>
      %257 = arith.mulf %253, %256 : vector<24x196xf32>
      %258 = vector.broadcast %254 : vector<24x1xf32> to vector<24x196xf32>
      %259 = arith.mulf %257, %258 : vector<24x196xf32>
      %260 = arith.addf %250, %259 : vector<24x196xf32>
      %cst_57 = arith.constant 0.000000e+00 : f32
      %261 = vector.broadcast %cst_57 : f32 to vector<24x29xf32>
      %262 = vector.extract_strided_slice %35 {offsets = [0, 29], sizes = [24, 167], strides = [1, 1]} : vector<24x196xf32> to vector<24x167xf32>
      %263 = tpu.concatenate %262, %261 in 1 : vector<24x167xf32>, vector<24x29xf32> -> vector<24x196xf32>
      %264 = vector.extract_strided_slice %6 {offsets = [0, 23], sizes = [24, 1], strides = [1, 1]} : vector<24x25xf32> to vector<24x1xf32>
      %c23 = arith.constant 23 : index
      %c0_58 = arith.constant 0 : index
      %265 = vector.load %arg7[%c23, %c0_58] : memref<25x196xf32, #tpu.memory_space<vmem>>, vector<1x196xf32>
      %266 = vector.broadcast %265 : vector<1x196xf32> to vector<24x196xf32>
      %267 = arith.mulf %263, %266 : vector<24x196xf32>
      %268 = vector.broadcast %264 : vector<24x1xf32> to vector<24x196xf32>
      %269 = arith.mulf %267, %268 : vector<24x196xf32>
      %270 = arith.addf %260, %269 : vector<24x196xf32>
      %cst_59 = arith.constant 0.000000e+00 : f32
      %271 = vector.broadcast %cst_59 : f32 to vector<24x30xf32>
      %272 = vector.extract_strided_slice %35 {offsets = [0, 30], sizes = [24, 166], strides = [1, 1]} : vector<24x196xf32> to vector<24x166xf32>
      %273 = tpu.concatenate %272, %271 in 1 : vector<24x166xf32>, vector<24x30xf32> -> vector<24x196xf32>
      %274 = vector.extract_strided_slice %6 {offsets = [0, 24], sizes = [24, 1], strides = [1, 1]} : vector<24x25xf32> to vector<24x1xf32>
      %c24 = arith.constant 24 : index
      %c0_60 = arith.constant 0 : index
      %275 = vector.load %arg7[%c24, %c0_60] : memref<25x196xf32, #tpu.memory_space<vmem>>, vector<1x196xf32>
      %276 = vector.broadcast %275 : vector<1x196xf32> to vector<24x196xf32>
      %277 = arith.mulf %273, %276 : vector<24x196xf32>
      %278 = vector.broadcast %274 : vector<24x1xf32> to vector<24x196xf32>
      %279 = arith.mulf %277, %278 : vector<24x196xf32>
      %280 = arith.addf %270, %279 : vector<24x196xf32>
      %cst_61 = arith.constant dense<0.000000e+00> : vector<24xf32>
      %281 = vector.multi_reduction <add>, %280, %cst_61 [1] : vector<24x196xf32> to vector<24xf32>
      %282 = vector.shape_cast %281 : vector<24xf32> to vector<24x1xf32>
      %cst_62 = arith.constant 0.00510204071 : f32
      %283 = vector.broadcast %cst_62 : f32 to vector<24x1xf32>
      %284 = arith.mulf %282, %283 : vector<24x1xf32>
      %285 = vector.broadcast %284 : vector<24x1xf32> to vector<24x196xf32>
      %286 = arith.subf %280, %285 : vector<24x196xf32>
      %287 = arith.mulf %286, %286 : vector<24x196xf32>
      %cst_63 = arith.constant dense<0.000000e+00> : vector<24xf32>
      %288 = vector.multi_reduction <add>, %287, %cst_63 [1] : vector<24x196xf32> to vector<24xf32>
      %289 = vector.shape_cast %288 : vector<24xf32> to vector<24x1xf32>
      %cst_64 = arith.constant 0.00510204071 : f32
      %290 = vector.broadcast %cst_64 : f32 to vector<24x1xf32>
      %291 = arith.mulf %289, %290 : vector<24x1xf32>
      %cst_65 = arith.constant 1.000000e-03 : f32
      %292 = vector.broadcast %cst_65 : f32 to vector<24x1xf32>
      %293 = arith.addf %291, %292 : vector<24x1xf32>
      %294 = math.rsqrt %293 : vector<24x1xf32>
      %295 = arith.mulf %12, %294 : vector<24x1xf32>
      %296 = vector.broadcast %295 : vector<24x1xf32> to vector<24x196xf32>
      %297 = arith.mulf %286, %296 : vector<24x196xf32>
      %298 = vector.broadcast %14 : vector<24x1xf32> to vector<24x196xf32>
      %299 = arith.addf %297, %298 : vector<24x196xf32>
      %300 = arith.index_cast %2 : i32 to index
      %c0_66 = arith.constant 0 : index
      %301 = vector.load %arg8[%300, %c0_66] : memref<168x196xf32, #tpu.memory_space<vmem>>, vector<24x196xf32>
      tpu.vector_store %arg8[%300, %c0_66], %299 {strides = array<i32>} : memref<168x196xf32, #tpu.memory_space<vmem>>, vector<24x196xf32>,
    }
    %c7_i32_0 = arith.constant 7 : i32
    return
  }
  func.func @transform_0(%arg0: i32) -> (i32, i32) {
    %c0_i32 = arith.constant 0 : i32
    %c0_i32_0 = arith.constant 0 : i32
    return %arg0, %c0_i32 : i32, i32
  }
  func.func @transform_1(%arg0: i32) -> (i32, i32) {
    %c0_i32 = arith.constant 0 : i32
    %c0_i32_0 = arith.constant 0 : i32
    return %arg0, %c0_i32 : i32, i32
  }
  func.func @transform_2(%arg0: i32) -> (i32, i32) {
    %c0_i32 = arith.constant 0 : i32
    %c0_i32_0 = arith.constant 0 : i32
    return %arg0, %c0_i32 : i32, i32
  }
  func.func @transform_3(%arg0: i32) -> (i32, i32) {
    %c0_i32 = arith.constant 0 : i32
    %c0_i32_0 = arith.constant 0 : i32
    return %arg0, %c0_i32 : i32, i32
  }
  func.func @transform_4(%arg0: i32) -> (i32, i32) {
    %c0_i32 = arith.constant 0 : i32
    %c0_i32_0 = arith.constant 0 : i32
    return %arg0, %c0_i32 : i32, i32
  }
  func.func @transform_5(%arg0: i32) -> (i32, i32) {
    %c0_i32 = arith.constant 0 : i32
    %c0_i32_0 = arith.constant 0 : i32
    return %arg0, %c0_i32 : i32, i32
  }
  func.func @transform_6(%arg0: i32) -> (i32, i32) {
    %c0_i32 = arith.constant 0 : i32
    %c0_i32_0 = arith.constant 0 : i32
    %c0_i32_1 = arith.constant 0 : i32
    return %c0_i32, %c0_i32_0 : i32, i32
  }
  func.func @transform_7(%arg0: i32) -> (i32, i32) {
    %c0_i32 = arith.constant 0 : i32
    %c0_i32_0 = arith.constant 0 : i32
    return %arg0, %c0_i32 : i32, i32
  }
}

</mosaic_0001>

<bundles_post_ra>
// kernel: fbnet_block.1
= control target key start
LH: loop header
LB: loop body
LE: loop exit
PB: predicated region body
PF: predicated region fallthrough
CT: control target
= control target key end

     0   :  { %s2733_s24 = smov 0   ;;  %s4264_s0 = inlined_call_operand.vmem [shape: f32[336,196], index: 0, kind: input, shape index: {}]   ;;  %s4265_s1 = inlined_call_operand.vmem [shape: f32[336,25], index: 1, kind: input, shape index: {}]   ;;  %s4266_s2 = inlined_call_operand.vmem [shape: f32[336,1], index: 2, kind: input, shape index: {}]   ;;  %s4267_s3 = inlined_call_operand.vmem [shape: f32[336,1], index: 3, kind: input, shape index: {}]   ;;  %s4268_s4 = inlined_call_operand.vmem [shape: f32[336,1], index: 4, kind: input, shape index: {}]   ;;  %s4269_s5 = inlined_call_operand.vmem [shape: f32[336,1], index: 5, kind: input, shape index: {}]   ;;  %s4270_s6 = inlined_call_operand.vmem [shape: f32[25,196], index: 6, kind: input, shape index: {}]   ;;  %s4271_s7 = inlined_call_operand.vmem [shape: f32[336,196], index: 7, kind: output, shape index: {}]  }
   0x1 LB: > { %s2449_s25 = sadd.s32 4294967295, %s2638_s24   ;;  %p2453_p0 = scmp.ge.s32.totalorder %s2638_s24, 1  ;;  %s2638_s24 = sphi %s2733_s24, %s17_s24  }
   0x2   : > { %p294_p1 = scmp.lt.s32.totalorder %s2638_s24, 3 }
   0x4   : > { %p295_p2 = pnand %p2453_p0, %p294_p1 }
   0x5   : > { %s353_s26 = smul.u32 (!%p295_p2), 21, %s2449_s25  ;;  %s2773_s30 = smov (!%p295_p2), 0  }
   0x6   : > { %298 = sbr.rel (%p295_p2) target bundleno = 1468 (0x5bc), region = 48 }
   0x7   : > { %p354_p3 = scmp.lt.s32.totalorder (!%p295_p2), %s353_s26, 41 }
   0xd   : > { %s4530_s26 = smov (!%p354_p3, %s353_s26), 41 }
   0xe   : > { %s2491_s27 = sshll.u32 %s4530_s26, 4  ;;  %s2741_s28 = sshll.u32 %s4530_s26, 3 }
   0xf   : > { %s2746_s8 = scalar_lea.vmem %s4264_s0, %s2491_s27  ;;  %s370_s14 = scalar_lea.vmem %s4266_s2, %s2741_s28 }
  0x10   : > { %s376_s17 = scalar_lea.vmem %s4267_s3, %s2741_s28  ;;  %s382_s20 = scalar_lea.vmem %s4268_s4, %s2741_s28 }
  0x11   : > { %s388_s23 = scalar_lea.vmem %s4269_s5, %s2741_s28  ;;  %s2771_s29 = scalar_lea.vmem %s4271_s7, %s2491_s27 }
  0x12 LB: >> { %v4272_v0 = vmov 0   ;;  %v2645_v1 = vmov 1   ;;  %s2780_s9 = smul.u32 24, %s2642_s30  ;;  %vm435_vm0 = vcmask 556032   ;;  %s4355_s11 = scalar_lea.vmem %s4265_s1, %s2741_s28  ;;  %v2646_v17 = vmov 2   ;;  %s2642_s30 = sphi %s2773_s30, %s402_s30  }
  0x13   : >> { %2560 = vset.pattern.permute.xlu1 %v4272_v0  ;;  %2561 = vset.pattern.permute.xlu0 %v2645_v1  ;;  %v2647_v18 = vmov 3   ;;  %v2648_v19 = vmov 4   ;;  %v2649_v20 = vmov 5   ;;  %v2650_v22 = vmov 6   ;;  %s2666_s27 = smov 30   ;;  %s2667_s10 = smov 29  }
  0x14   : >> { %s2788_s12 = scalar_lea.vmem %s376_s17, %s2780_s9  ;;  %s404_s13 = sshra.s32 %s2780_s9, 3  ;;  %v2651_v23 = vmov 7   ;;  %v2652_v25 = vmov 8   ;;  %v2653_v27 = vmov 9   ;;  %v2654_v28 = vmov 10  }
  0x15   : >> { %v424_v2 = vld [vmem:[%s2788_s12] sm:$0xff]  ;;  %s2792_s15 = sshll.u32 %s404_s13, 4  ;;  %v425_v3 = vld [vmem:[%s2788_s12 + $0x8] sm:$0xff]  ;;  %s2817_s21 = scalar_lea.vmem %s4355_s11, %s2780_s9  ;;  %v426_v21 = vld [vmem:[%s2788_s12 + $0x10] sm:$0xff]  ;;  %v2655_v29 = vmov 11   ;;  %v2656_v30 = vmov 12  }
  0x16   : >> { %510 = vperm.xlu1 %2560, %v424_v2   ;;  %s408_s16 = scalar_lea.vmem %s2746_s8, %s2792_s15  ;;  %v2820_v12 = vld [vmem:[%s2817_s21] sm:$0xff]  ;;  %v2838_v24 = vld [vmem:[%s2817_s21 + $0x10] sm:$0xff]  ;;  %v2843_v26 = vld [vmem:[%s2817_s21 + $0x8] sm:$0xff]  ;;  %v2657_v31 = vmov 13   ;;  %v2658_v32 = vmov 14   ;;  %v2659_v33 = vmov 15   ;;  %s3044_s26 = scalar_lea.vmem %s370_s14, %s2780_s9 }
  0x17   : >> { %v2797_v4 = vld [vmem:[%s408_s16] sm:$0xff]  ;;  %v2799_v5 = vld [vmem:[%s408_s16 + $0x8] sm:$0xff]  ;;  %v2803_v7 = vld [vmem:[%s408_s16 + $0x10] sm:$0xff]  ;;  %v2660_v34 = vmov 16   ;;  %v2661_v35 = vmov 17   ;;  %v2662_v41 = vmov 18  }
  0x18   : >> { %v436_v6 = vsel %vm435_vm0, %v2799_v5, 0.0  ;;  %v2805_v8 = vld [vmem:[%s408_s16 + $0x18] sm:$0xff]  ;;  %v2822_v13 = vld [vmem:[%s408_s16 + $0x28] sm:$0xff]  ;;  %v2825_v14 = vld [vmem:[%s408_s16 + $0x20] sm:$0xff]  ;;  %v2663_v50 = vmov 19   ;;  %v2664_v52 = vmov 20  }
  0x19   : >> { %v437_v9 = vadd.f32 %v436_v6, %v2797_v4  ;;  %v440_v10 = vsel %vm435_vm0, %v2805_v8, 0.0  ;;  %v444_v15 = vsel %vm435_vm0, %v2822_v13, 0.0  ;;  %v2665_v55 = vmov 21   ;;  %s2668_s12 = smov 28   ;;  %s2669_s13 = smov 27  }
  0x1a   : >> { %515 = vperm.xlu1 %2560, %v425_v3   ;;  %v441_v11 = vadd.f32 %v440_v10, %v2803_v7  ;;  %v445_v16 = vadd.f32 %v444_v15, %v2825_v14  ;;  %s2670_s16 = smov 26   ;;  %s2671_s18 = smov 16   ;;  %vm553_vm1 = vcmask 244736   ;;  %vm623_vm2 = vcmask 236544  }
  0x1b   : >> { %438 = vadd.xlane.f32.xlu0 %v437_v9  ;;  %s2672_s19 = smov 15   ;;  %s2673_s22 = smov 14   ;;  %vm691_vm3 = vcmask 228352   ;;  %vm759_vm4 = vcmask 220160   ;;  %vm827_vm5 = vcmask 211968   ;;  %vm895_vm6 = vcmask 130048  }
  0x1c   : >> { %s2674_s25 = smov 13   ;;  %vm963_vm7 = vcmask 121856   ;;  %vm1031_vm8 = vcmask 113664   ;;  %vm1099_vm9 = vcmask 105472   ;;  %vm1167_vm10 = vcmask 97280   ;;  %s402_s30 = sadd.s32 1, %s2642_s30  }
  0x1d   : >> { %vm1235_vm11 = vcmask 15360   ;;  %vm1303_vm12 = vcmask 7168   ;;  %vm1395_vm13 = vcmask 1039360   ;;  %vm1405_vm14 = vcmask 547840   ;;  %p399_p4 = scmp.ge.s32.totalorder %s402_s30, 7  }
  0x1e   : >> { %vm1474_vm15 = vcmask 539648  }
  0x1f   : >> { %442 = vadd.xlane.f32.xlu0 %v441_v11 }
  0x35   : >> { %656 = vperm.xlu0 %2561, %v2820_v12  }
  0x39   : >> { %2563 = vset.pattern.permute.xlu0 %v2646_v17 }
  0x3a   : >> { %724 = vperm.xlu0 %2563, %v2820_v12  }
  0x3e   : >> { %446 = vadd.xlane.f32.xlu1 %v445_v16  ;;  %2565 = vset.pattern.permute.xlu0 %v2647_v18 }
  0x3f   : >> { %792 = vperm.xlu0 %2565, %v2820_v12  }
  0x43   : >> { %2567 = vset.pattern.permute.xlu0 %v2648_v19 }
  0x44   : >> { %860 = vperm.xlu0 %2567, %v2820_v12  }
  0x48   : >> { %2569 = vset.pattern.permute.xlu0 %v2649_v20 }
  0x49   : >> { %928 = vperm.xlu0 %2569, %v2820_v12  }
  0x4d   : >> { %2571 = vset.pattern.permute.xlu0 %v2650_v22 }
  0x4e   : >> { %996 = vperm.xlu0 %2571, %v2820_v12  }
  0x4f   : >> { %520 = vperm.xlu1 %2560, %v426_v21  }
  0x52   : >> { %2573 = vset.pattern.permute.xlu0 %v2651_v23 }
  0x53   : >> { %586 = vperm.xlu1 %2560, %v2820_v12   ;;  %1064 = vperm.xlu0 %2573, %v2820_v12  }
  0x57   : >> { %596 = vperm.xlu1 %2560, %v2838_v24   ;;  %2575 = vset.pattern.permute.xlu0 %v2652_v25 }
  0x58   : >> { %1132 = vperm.xlu0 %2575, %v2820_v12  }
  0x5b   : >> { %2562 = vset.pattern.permute.xlu1 %v2645_v1 }
  0x5c   : >> { %660 = vperm.xlu1 %2562, %v2843_v26   ;;  %2577 = vset.pattern.permute.xlu0 %v2653_v27 }
  0x5d   : >> { %1200 = vperm.xlu0 %2577, %v2820_v12  }
  0x60   : >> { %664 = vperm.xlu1 %2562, %v2838_v24  }
  0x61   : >> { %2579 = vset.pattern.permute.xlu0 %v2654_v28 }
  0x62   : >> { %1268 = vperm.xlu0 %2579, %v2820_v12  }
  0x64   : >> { %2564 = vset.pattern.permute.xlu1 %v2646_v17 }
  0x65   : >> { %728 = vperm.xlu1 %2564, %v2843_v26  }
  0x66   : >> { %2581 = vset.pattern.permute.xlu0 %v2655_v29 }
  0x67   : >> { %1336 = vperm.xlu0 %2581, %v2820_v12  }
  0x69   : >> { %732 = vperm.xlu1 %2564, %v2838_v24  }
  0x6b   : >> { %2583 = vset.pattern.permute.xlu0 %v2656_v30 }
  0x6c   : >> { %1360 = vperm.xlu0 %2583, %v2820_v12  }
  0x6d   : >> { %2566 = vset.pattern.permute.xlu1 %v2647_v18 }
  0x6e   : >> { %796 = vperm.xlu1 %2566, %v2843_v26  }
  0x70   : >> { %2585 = vset.pattern.permute.xlu0 %v2657_v31 }
  0x71   : >> { %1429 = vperm.xlu0 %2585, %v2820_v12  }
  0x72   : >> { %800 = vperm.xlu1 %2566, %v2838_v24  }
  0x75   : >> { %2588 = vset.pattern.permute.xlu0 %v2658_v32 }
  0x76   : >> { %2568 = vset.pattern.permute.xlu1 %v2648_v19  ;;  %1502 = vperm.xlu0 %2588, %v2843_v26  }
  0x77   : >> { %864 = vperm.xlu1 %2568, %v2843_v26  }
  0x7a   : >> { %2590 = vset.pattern.permute.xlu0 %v2659_v33 }
  0x7b   : >> { %868 = vperm.xlu1 %2568, %v2838_v24   ;;  %1571 = vperm.xlu0 %2590, %v2843_v26  }
  0x7f   : >> { %2570 = vset.pattern.permute.xlu1 %v2649_v20  ;;  %2591 = vset.pattern.permute.xlu0 %v2660_v34 }
  0x80   : >> { %932 = vperm.xlu1 %2570, %v2843_v26   ;;  %1636 = vperm.xlu0 %2591, %v2820_v12  }
  0x84   : >> { %936 = vperm.xlu1 %2570, %v2838_v24   ;;  %2594 = vset.pattern.permute.xlu0 %v2661_v35 }
  0x85   : >> { %1709 = vperm.xlu0 %2594, %v2843_v26  }
  0x88   : >> { %2572 = vset.pattern.permute.xlu1 %v2650_v22 }
  0x89   : >> { %1000 = vperm.xlu1 %2572, %v2843_v26   ;;  %2596 = vset.pattern.permute.xlu0 %v2662_v41 }
  0x8d   : >> { %1004 = vperm.xlu1 %2572, %v2838_v24  }
  0x91   : >> { %2574 = vset.pattern.permute.xlu1 %v2651_v23 }
  0x92   : >> { %1068 = vperm.xlu1 %2574, %v2843_v26  }
  0x95   : >> { %v2895_v46 = vpop.permute.xlu1 %510 }
  0x96   : >> { %1072 = vperm.xlu1 %2574, %v2838_v24  }
  0x99   : >> { %v2898_v47 = vpop.permute.xlu1 %515 }
  0x9a   : >> { %2576 = vset.pattern.permute.xlu1 %v2652_v25 }
  0x9b   : >> { %1136 = vperm.xlu1 %2576, %v2843_v26  }
  0x9f   : >> { %1140 = vperm.xlu1 %2576, %v2838_v24  }
  0xa3   : >> { %2578 = vset.pattern.permute.xlu1 %v2653_v27 }
  0xa4   : >> { %1204 = vperm.xlu1 %2578, %v2843_v26  }
  0xa8   : >> { %1208 = vperm.xlu1 %2578, %v2838_v24   ;;  %v2876_v36 = vpop.xlane.xlu0 %438 }
  0xa9   : >> { %v448_v6 = vmul.f32 0.0051020407, %v2876_v36 }
  0xab   : >> { %v2962_v15 = vsub.f32 %v2797_v4, %v448_v6 }
  0xac   : >> { %2580 = vset.pattern.permute.xlu1 %v2654_v28  ;;  %v443_v37 = vpop.xlane.xlu0 %442 }
  0xad   : >> { %1272 = vperm.xlu1 %2580, %v2843_v26   ;;  %v449_v38 = vmul.f32 0.0051020407, %v443_v37  ;;  %v457_v18 = vmul.f32 %v2962_v15, %v2962_v15 }
  0xaf   : >> { %v2880_v39 = vsub.f32 %v2803_v7, %v449_v38  ;;  %v2883_v40 = vsub.f32 %v2805_v8, %v449_v38  ;;  %v2955_v8 = vsub.f32 %v2799_v5, %v448_v6 }
  0xb1   : >> { %1276 = vperm.xlu1 %2580, %v2838_v24   ;;  %v459_v42 = vmul.f32 %v2880_v39, %v2880_v39  ;;  %v460_v43 = vmul.f32 %v2883_v40, %v2883_v40  ;;  %v458_v16 = vmul.f32 %v2955_v8, %v2955_v8 }
  0xb3   : >> { %v467_v44 = vsel %vm435_vm0, %v460_v43, 0.0  ;;  %v463_v20 = vsel %vm435_vm0, %v458_v16, 0.0 }
  0xb4   : >> { %v468_v45 = vadd.f32 %v467_v44, %v459_v42  ;;  %v2922_v56 = vpop.permute.xlu0 %656  ;;  %v464_v22 = vadd.f32 %v463_v20, %v457_v18 }
  0xb5   : >> { %2582 = vset.pattern.permute.xlu1 %v2655_v29 }
  0xb6   : >> { %1340 = vperm.xlu1 %2582, %v2843_v26   ;;  %469 = vadd.xlane.f32.xlu0 %v468_v45 }
  0xb9   : >> { %v2930_v58 = vpop.permute.xlu0 %724 }
  0xba   : >> { %1344 = vperm.xlu1 %2582, %v2838_v24  }
  0xbe   : >> { %2584 = vset.pattern.permute.xlu1 %v2656_v30  ;;  %v2935_v60 = vpop.permute.xlu0 %792 }
  0xbf   : >> { %1364 = vperm.xlu1 %2584, %v2843_v26  }
  0xc3   : >> { %1368 = vperm.xlu1 %2584, %v2838_v24   ;;  %v2941_v62 = vpop.permute.xlu0 %860 }
  0xc4   : >> { %4356 = vst [vmem:[#allocation2_spill] sm:$0xff] %v2941_v62  ;;  %v2471_v62 = vld [vmem:[%s4270_s6 + $0x7] ss:$8 sm:$0x3] }
  0xc7   : >> { %2586 = vset.pattern.permute.xlu1 %v2657_v31 }
  0xc8   : >> { %1433 = vperm.xlu1 %2586, %v2843_v26   ;;  %v2945_v1 = vpop.permute.xlu0 %928 }
  0xc9   : >> { %4358 = vst [vmem:[#allocation4_spill] sm:$0xff] %v2945_v1  ;;  %v2468_v1 = vld [vmem:[%s4270_s6 + $0x4] ss:$8 sm:$0x3] }
  0xcb   : >> { %v447_v48 = vpop.xlane.xlu1 %446 }
  0xcc   : >> { %1437 = vperm.xlu1 %2586, %v2838_v24   ;;  %1778 = vperm.xlu0 %2596, %v2843_v26   ;;  %v450_v10 = vmul.f32 0.0051020407, %v447_v48 }
  0xcd   : >> { %v2949_v3 = vpop.permute.xlu0 %996 }
  0xce   : >> { %4360 = vst [vmem:[#allocation6_spill] sm:$0xff] %v2949_v3  ;;  %v2967_v17 = vsub.f32 %v2822_v13, %v450_v10  ;;  %v2977_v21 = vsub.f32 %v2825_v14, %v450_v10  ;;  %v421_v10 = vld [vmem:[%s3044_s26 + $0x8] sm:$0xff] }
  0xcf   : >> { %v2903_v49 = vpop.permute.xlu1 %520 }
  0xd0   : >> { %2587 = vset.pattern.permute.xlu1 %v2658_v32  ;;  %2598 = vset.pattern.permute.xlu0 %v2663_v50  ;;  %v462_v4 = vmul.f32 %v2967_v17, %v2967_v17  ;;  %v461_v13 = vmul.f32 %v2977_v21, %v2977_v21 }
  0xd1   : >> { %1498 = vperm.xlu1 %2587, %v2820_v12   ;;  %1847 = vperm.xlu0 %2598, %v2843_v26  }
  0xd2   : >> { %v2957_v9 = vpop.permute.xlu0 %1064 }
  0xd3   : >> { %v2908_v51 = vpop.permute.xlu1 %586  ;;  %4362 = vst [vmem:[#allocation8_spill] sm:$0xff] %v2957_v9 }
  0xd5   : >> { %1506 = vperm.xlu1 %2587, %v2838_v24   ;;  %2600 = vset.pattern.permute.xlu0 %v2664_v52 }
  0xd6   : >> { %1916 = vperm.xlu0 %2600, %v2843_v26  }
  0xd7   : >> { %v2912_v53 = vpop.permute.xlu1 %596  ;;  %v2971_v19 = vpop.permute.xlu0 %1132 }
  0xd8   : >> { %4364 = vst [vmem:[#allocation10_spill] sm:$0xff] %v2971_v19 }
  0xd9   : >> { %2589 = vset.pattern.permute.xlu1 %v2659_v33 }
  0xda   : >> { %1567 = vperm.xlu1 %2589, %v2820_v12   ;;  %2602 = vset.pattern.permute.xlu0 %v2665_v55 }
  0xdb   : >> { %v2917_v54 = vpop.permute.xlu1 %660  ;;  %1985 = vperm.xlu0 %2602, %v2843_v26  }
  0xdc   : >> { %v2983_v23 = vpop.permute.xlu0 %1200 }
  0xdd   : >> { %4366 = vst [vmem:[#allocation12_spill] sm:$0xff] %v2983_v23 }
  0xde   : >> { %1575 = vperm.xlu1 %2589, %v2838_v24  }
  0xdf   : >> { %v2924_v57 = vpop.permute.xlu1 %664  ;;  %2603 = vset.pattern.permute.xlu0 %v4272_v0 }
  0xe0   : >> { %591 = vperm.xlu0 %2603, %v2843_v26  }
  0xe1   : >> { %v2988_v28 = vpop.permute.xlu0 %1268 }
  0xe2   : >> { %2592 = vset.pattern.permute.xlu1 %v2660_v34  ;;  %4368 = vst [vmem:[#allocation14_spill] sm:$0xff] %v2988_v28 }
  0xe3   : >> { %1640 = vperm.xlu1 %2592, %v2843_v26   ;;  %v471_v26 = vsel %vm435_vm0, %v462_v4, 0.0 }
  0xe4   : >> { %v2932_v59 = vpop.permute.xlu1 %728  ;;  %v472_v27 = vadd.f32 %v471_v26, %v461_v13 }
  0xe6   : >> { %v2992_v29 = vpop.permute.xlu0 %1336 }
  0xe7   : >> { %1644 = vperm.xlu1 %2592, %v2838_v24   ;;  %4370 = vst [vmem:[#allocation16_spill] sm:$0xff] %v2992_v29 }
  0xe8   : >> { %v2937_v61 = vpop.permute.xlu1 %732 }
  0xeb   : >> { %2593 = vset.pattern.permute.xlu1 %v2661_v35  ;;  %v2996_v31 = vpop.permute.xlu0 %1360 }
  0xec   : >> { %1705 = vperm.xlu1 %2593, %v2820_v12   ;;  %4372 = vst [vmem:[#allocation18_spill] sm:$0xff] %v2996_v31 }
  0xed   : >> { %v2943_v63 = vpop.permute.xlu1 %796 }
  0xee   : >> { %4357 = vst [vmem:[#allocation3_spill] sm:$0xff] %v2943_v63 }
  0xf0   : >> { %v3001_v33 = vpop.permute.xlu0 %1429 }
  0xf1   : >> { %v2947_v2 = vpop.permute.xlu1 %800  ;;  %4374 = vst [vmem:[#allocation20_spill] sm:$0xff] %v3001_v33 }
  0xf2   : >> { %4359 = vst [vmem:[#allocation5_spill] sm:$0xff] %v2947_v2 }
  0xf5   : >> { %v3007_v35 = vpop.permute.xlu0 %1502 }
  0xf6   : >> { %v2952_v7 = vpop.permute.xlu1 %864  ;;  %4376 = vst [vmem:[#allocation22_spill] sm:$0xff] %v3007_v35 }
  0xf7   : >> { %4361 = vst [vmem:[#allocation7_spill] sm:$0xff] %v2952_v7 }
  0xfa   : >> { %v2959_v11 = vpop.permute.xlu1 %868  ;;  %v3012_v37 = vpop.permute.xlu0 %1571 }
  0xfb   : >> { %4363 = vst [vmem:[#allocation9_spill] sm:$0xff] %v2959_v11  ;;  %4378 = vst [vmem:[#allocation24_spill] sm:$0xff] %v3012_v37  ;;  %v2469_v11 = vld [vmem:[%s4270_s6 + $0x5] ss:$8 sm:$0x3] }
  0xff   : >> { %v2973_v5 = vpop.permute.xlu1 %932  ;;  %v3019_v42 = vpop.permute.xlu0 %1636 }
 0x100   : >> { %4365 = vst [vmem:[#allocation11_spill] sm:$0xff] %v2973_v5  ;;  %4380 = vst [vmem:[#allocation26_spill] sm:$0xff] %v3019_v42  ;;  %v2466_v5 = vld [vmem:[%s4270_s6 + $0x2] ss:$8 sm:$0x3] }
 0x103   : >> { %v2985_v25 = vpop.permute.xlu1 %936 }
 0x104   : >> { %4367 = vst [vmem:[#allocation13_spill] sm:$0xff] %v2985_v25  ;;  %v3025_v43 = vpop.permute.xlu0 %1709 }
 0x105   : >> { %4382 = vst [vmem:[#allocation28_spill] sm:$0xff] %v3025_v43 }
 0x108   : >> { %v2990_v14 = vpop.permute.xlu1 %1000 }
 0x109   : >> { %4369 = vst [vmem:[#allocation15_spill] sm:$0xff] %v2990_v14  ;;  %v2465_v14 = vld [vmem:[%s4270_s6 + $0x1] ss:$8 sm:$0x3] }
 0x10c   : >> { %v2994_v30 = vpop.permute.xlu1 %1004 }
 0x10d   : >> { %4371 = vst [vmem:[#allocation17_spill] sm:$0xff] %v2994_v30 }
 0x110   : >> { %465 = vadd.xlane.f32.xlu1 %v464_v22 }
 0x111   : >> { %v2998_v32 = vpop.permute.xlu1 %1068 }
 0x112   : >> { %4373 = vst [vmem:[#allocation19_spill] sm:$0xff] %v2998_v32 }
 0x114   : >> { %473 = vadd.xlane.f32.xlu1 %v472_v27 }
 0x115   : >> { %v3003_v34 = vpop.permute.xlu1 %1072 }
 0x116   : >> { %4375 = vst [vmem:[#allocation21_spill] sm:$0xff] %v3003_v34 }
 0x11a   : >> { %v3009_v36 = vpop.permute.xlu1 %1136 }
 0x11b   : >> { %4377 = vst [vmem:[#allocation23_spill] sm:$0xff] %v3009_v36 }
 0x11e   : >> { %v3015_v38 = vpop.permute.xlu1 %1140 }
 0x11f   : >> { %4379 = vst [vmem:[#allocation25_spill] sm:$0xff] %v3015_v38 }
 0x125   : >> { %1713 = vperm.xlu1 %2593, %v2838_v24  }
 0x129   : >> { %2595 = vset.pattern.permute.xlu1 %v2662_v41  ;;  %v3021_v41 = vpop.permute.xlu1 %1204 }
 0x12a   : >> { %1774 = vperm.xlu1 %2595, %v2820_v12   ;;  %4381 = vst [vmem:[#allocation27_spill] sm:$0xff] %v3021_v41  ;;  %v568_v41 = vlaneseq }
 0x12c   : >> { %v569_v19 = vshrl.u32 %v568_v41, 7  ;;  %v566_v41 = vld [vmem:[%s4270_s6] ss:$8 sm:$0x3] }
 0x12d   : >> { %v3027_v44 = vpop.permute.xlu1 %1208 }
 0x12e   : >> { %1782 = vperm.xlu1 %2595, %v2838_v24   ;;  %4383 = vst [vmem:[#allocation29_spill] sm:$0xff] %v3027_v44  ;;  %v3294_v9 = vsub.s32 0, %v569_v19  ;;  %v3296_v30 = vsub.s32 1, %v569_v19  ;;  %v2467_v19 = vld [vmem:[%s4270_s6 + $0x3] ss:$8 sm:$0x3] }
 0x130   : >> { %4421 = vst [vmem:[#allocation67_spill] sm:$0xff] %v3294_v9  ;;  %v3360_v2 = vrot.slane %v2468_v1, %v3294_v9 }
 0x131   : >> { %v3031_v48 = vpop.permute.xlu1 %1272 }
 0x132   : >> { %2597 = vset.pattern.permute.xlu1 %v2663_v50  ;;  %4384 = vst [vmem:[#allocation30_spill] sm:$0xff] %v3031_v48  ;;  %4427 = vst [vmem:[#allocation73_spill] sm:$0xff] %v3360_v2 }
 0x133   : >> { %1843 = vperm.xlu1 %2597, %v2820_v12  }
 0x137   : >> { %1851 = vperm.xlu1 %2597, %v2838_v24  }
 0x13b   : >> { %2599 = vset.pattern.permute.xlu1 %v2664_v52  ;;  %v3035_v52 = vpop.permute.xlu1 %1276 }
 0x13c   : >> { %1912 = vperm.xlu1 %2599, %v2820_v12   ;;  %4385 = vst [vmem:[#allocation31_spill] sm:$0xff] %v3035_v52 }
 0x140   : >> { %1920 = vperm.xlu1 %2599, %v2838_v24  }
 0x143   : >> { %v470_v45 = vpop.xlane.xlu0 %469 }
 0x144   : >> { %2601 = vset.pattern.permute.xlu1 %v2665_v55  ;;  %v476_v50 = vmul.f32 0.0051020407, %v470_v45  ;;  %v3046_v55 = vpop.permute.xlu1 %1340 }
 0x145   : >> { %1981 = vperm.xlu1 %2601, %v2820_v12   ;;  %4386 = vst [vmem:[#allocation32_spill] sm:$0xff] %v3046_v55 }
 0x146   : >> { %v479_v6 = vadd.f32 0.001, %v476_v50 }
 0x148   : >> { %2613 = vrsqrt.f32 %v479_v6  ;;  %v3049_v18 = vpop.permute.xlu1 %1344 }
 0x149   : >> { %1989 = vperm.xlu1 %2601, %v2838_v24   ;;  %4387 = vst [vmem:[#allocation33_spill] sm:$0xff] %v3049_v18 }
 0x14c   : >> { %v3051_v24 = vpop.permute.xlu1 %1364 }
 0x14d   : >> { %2604 = vset.pattern.permute.xlu1 %v4272_v0  ;;  %4388 = vst [vmem:[#allocation34_spill] sm:$0xff] %v3051_v24 }
 0x150   : >> { %v3053_v20 = vpop.permute.xlu1 %1368 }
 0x151   : >> { %4389 = vst [vmem:[#allocation35_spill] sm:$0xff] %v3053_v20 }
 0x152   : >> { %v2614_v16 = vpop.eup %2613 }
 0x153   : >> { %v485_v12 = vmul.f32 %v2614_v16, %v421_v10 }
 0x154   : >> { %v3055_v4 = vpop.permute.xlu1 %1433 }
 0x155   : >> { %494 = vperm.xlu1 %2604, %v485_v12   ;;  %4390 = vst [vmem:[#allocation36_spill] sm:$0xff] %v3055_v4 }
 0x158   : >> { %v3057_v22 = vpop.permute.xlu1 %1437 }
 0x159   : >> { %4391 = vst [vmem:[#allocation37_spill] sm:$0xff] %v3057_v22 }
 0x15c   : >> { %v3059_v13 = vpop.permute.xlu1 %1498 }
 0x15d   : >> { %4392 = vst [vmem:[#allocation38_spill] sm:$0xff] %v3059_v13 }
 0x160   : >> { %v3061_v26 = vpop.permute.xlu1 %1506 }
 0x161   : >> { %4393 = vst [vmem:[#allocation39_spill] sm:$0xff] %v3061_v26 }
 0x164   : >> { %v3063_v27 = vpop.permute.xlu1 %1567 }
 0x165   : >> { %4394 = vst [vmem:[#allocation40_spill] sm:$0xff] %v3063_v27 }
 0x168   : >> { %v3065_v45 = vpop.permute.xlu1 %1575 }
 0x169   : >> { %4395 = vst [vmem:[#allocation41_spill] sm:$0xff] %v3065_v45  ;;  %v420_v45 = vld [vmem:[%s3044_s26] sm:$0xff] }
 0x16c   : >> { %v3067_v50 = vpop.permute.xlu1 %1640 }
 0x16d   : >> { %4396 = vst [vmem:[#allocation42_spill] sm:$0xff] %v3067_v50 }
 0x170   : >> { %v3069_v6 = vpop.permute.xlu1 %1644 }
 0x171   : >> { %4397 = vst [vmem:[#allocation43_spill] sm:$0xff] %v3069_v6  ;;  %v422_v6 = vld [vmem:[%s3044_s26 + $0x10] sm:$0xff]  ;;  %s2675_s26 = smov 12  }
 0x174   : >> { %v3071_v10 = vpop.permute.xlu1 %1705 }
 0x175   : >> { %4398 = vst [vmem:[#allocation44_spill] sm:$0xff] %v3071_v10 }
 0x19d   : >> { %v466_v16 = vpop.xlane.xlu1 %465 }
 0x19e   : >> { %v475_v12 = vmul.f32 0.0051020407, %v466_v16 }
 0x1a0   : >> { %v478_v0 = vadd.f32 0.001, %v475_v12 }
 0x1a1   : >> { %v474_v43 = vpop.xlane.xlu1 %473 }
 0x1a2   : >> { %2615 = vrsqrt.f32 %v478_v0  ;;  %v477_v42 = vmul.f32 0.0051020407, %v474_v43 }
 0x1a4   : >> { %v480_v37 = vadd.f32 0.001, %v477_v42 }
 0x1a5   : >> { %v3073_v26 = vpop.permute.xlu1 %1713 }
 0x1a6   : >> { %4399 = vst [vmem:[#allocation45_spill] sm:$0xff] %v3073_v26  ;;  %2617 = vrsqrt.f32 %v480_v37 }
 0x1a9   : >> { %v3075_v27 = vpop.permute.xlu1 %1774 }
 0x1aa   : >> { %4400 = vst [vmem:[#allocation46_spill] sm:$0xff] %v3075_v27 }
 0x1ac   : >> { %v2616_v13 = vpop.eup %2615 }
 0x1ad   : >> { %v484_v50 = vmul.f32 %v2616_v13, %v420_v45  ;;  %v3078_v22 = vpop.permute.xlu1 %1782 }
 0x1ae   : >> { %4401 = vst [vmem:[#allocation47_spill] sm:$0xff] %v3078_v22 }
 0x1af   : >> { %489 = vperm.xlu0 %2603, %v484_v50  }
 0x1b0   : >> { %v2618_v10 = vpop.eup %2617 }
 0x1b1   : >> { %v486_v35 = vmul.f32 %v2618_v10, %v422_v6 }
 0x1b2   : >> { %v3081_v16 = vpop.permute.xlu1 %1843 }
 0x1b3   : >> { %4402 = vst [vmem:[#allocation48_spill] sm:$0xff] %v3081_v16  ;;  %499 = vperm.xlu1 %2604, %v486_v35   ;;  %v3099_v35 = vpop.permute.xlu0 %1778 }
 0x1b4   : >> { %4408 = vst [vmem:[#allocation54_spill] sm:$0xff] %v3099_v35 }
 0x1b6   : >> { %v3083_v0 = vpop.permute.xlu1 %1851 }
 0x1b7   : >> { %4403 = vst [vmem:[#allocation49_spill] sm:$0xff] %v3083_v0  ;;  %v3101_v6 = vpop.permute.xlu0 %1847 }
 0x1b8   : >> { %4409 = vst [vmem:[#allocation55_spill] sm:$0xff] %v3101_v6 }
 0x1bb   : >> { %v3085_v42 = vpop.permute.xlu1 %1912  ;;  %v3103_v10 = vpop.permute.xlu0 %1916 }
 0x1bc   : >> { %4404 = vst [vmem:[#allocation50_spill] sm:$0xff] %v3085_v42  ;;  %4410 = vst [vmem:[#allocation56_spill] sm:$0xff] %v3103_v10 }
 0x1bf   : >> { %v3087_v43 = vpop.permute.xlu1 %1920 }
 0x1c0   : >> { %4405 = vst [vmem:[#allocation51_spill] sm:$0xff] %v3087_v43  ;;  %v3105_v43 = vpop.permute.xlu0 %1985 }
 0x1c1   : >> { %4411 = vst [vmem:[#allocation57_spill] sm:$0xff] %v3105_v43 }
 0x1c4   : >> { %v3089_v37 = vpop.permute.xlu1 %1981 }
 0x1c5   : >> { %4406 = vst [vmem:[#allocation52_spill] sm:$0xff] %v3089_v37 }
 0x1c8   : >> { %v3091_v12 = vpop.permute.xlu1 %1989 }
 0x1c9   : >> { %4407 = vst [vmem:[#allocation53_spill] sm:$0xff] %v3091_v12  ;;  %v3107_v12 = vpop.permute.xlu0 %591 }
 0x1d4   : >> { %v495_v13 = vpop.permute.xlu1 %494 }
 0x1d5   : >> { %v505_v45 = vmul.f32 %v495_v13, %v2883_v40  ;;  %v504_v0 = vmul.f32 %v495_v13, %v2880_v39 }
 0x1d7   : >> { %v526_v50 = vadd.f32 %v2898_v47, %v505_v45 }
 0x1d9   : >> { %v3095_v22 = vmax.f32 %v526_v50, 0.0 }
 0x1db   : >> { %547 = vrot.lane.b32.xlu0 %v3095_v22, %s2666_s27 }
 0x22e   : >> { %v490_v37 = vpop.permute.xlu0 %489 }
 0x22f   : >> { %v502_v40 = vmul.f32 %v490_v37, %v2962_v15  ;;  %v503_v45 = vmul.f32 %v490_v37, %v2955_v8  ;;  %v525_v15 = vadd.f32 %v2898_v47, %v504_v0 }
 0x231   : >> { %v523_v50 = vadd.f32 %v2895_v46, %v502_v40  ;;  %v524_v16 = vadd.f32 %v2895_v46, %v503_v45  ;;  %v3130_v39 = vmax.f32 %v525_v15, 0.0 }
 0x232   : >> { %v500_v42 = vpop.permute.xlu1 %499 }
 0x233   : >> { %v3114_v35 = vmax.f32 %v523_v50, 0.0  ;;  %v507_v10 = vmul.f32 %v500_v42, %v2967_v17  ;;  %v3121_v6 = vmax.f32 %v524_v16, 0.0  ;;  %v506_v8 = vmul.f32 %v500_v42, %v2977_v21 }
 0x235   : >> { %v528_v43 = vadd.f32 %v2903_v49, %v507_v10  ;;  %541 = vrot.lane.b32.xlu1 %v3114_v35, %s2666_s27  ;;  %v527_v46 = vadd.f32 %v2903_v49, %v506_v8  ;;  %v2676_v49 = vmov 22  }
 0x236   : >> { %2606 = vset.pattern.permute.xlu0 %v2676_v49  ;;  %2605 = vset.pattern.permute.xlu1 %v2676_v49 }
 0x237   : >> { %v3124_v37 = vmax.f32 %v528_v43, 0.0  ;;  %v3136_v47 = vmax.f32 %v527_v46, 0.0 }
 0x239   : >> { %551 = vrot.lane.b32.xlu0 %v3124_v37, %s2666_s27  ;;  %543 = vrot.lane.b32.xlu1 %v3121_v6, %s2666_s27 }
 0x23d   : >> { %611 = vrot.lane.b32.xlu0 %v3114_v35, %s2667_s10  ;;  %545 = vrot.lane.b32.xlu1 %v3130_v39, %s2666_s27 }
 0x241   : >> { %615 = vrot.lane.b32.xlu0 %v3130_v39, %s2667_s10  ;;  %549 = vrot.lane.b32.xlu1 %v3136_v47, %s2666_s27  ;;  %s2677_s27 = smov 2  }
 0x245   : >> { %619 = vrot.lane.b32.xlu0 %v3136_v47, %s2667_s10  ;;  %613 = vrot.lane.b32.xlu1 %v3121_v6, %s2667_s10 }
 0x249   : >> { %679 = vrot.lane.b32.xlu0 %v3114_v35, %s2668_s12  ;;  %617 = vrot.lane.b32.xlu1 %v3095_v22, %s2667_s10 }
 0x24d   : >> { %683 = vrot.lane.b32.xlu0 %v3130_v39, %s2668_s12  ;;  %621 = vrot.lane.b32.xlu1 %v3124_v37, %s2667_s10  ;;  %v3191_v17 = vpop.permute.xlu0 %547  ;;  %s2678_s10 = smov 1  }
 0x251   : >> { %687 = vrot.lane.b32.xlu0 %v3136_v47, %s2668_s12  ;;  %681 = vrot.lane.b32.xlu1 %v3121_v6, %s2668_s12 }
 0x255   : >> { %747 = vrot.lane.b32.xlu0 %v3114_v35, %s2669_s13  ;;  %685 = vrot.lane.b32.xlu1 %v3095_v22, %s2668_s12 }
 0x259   : >> { %751 = vrot.lane.b32.xlu0 %v3130_v39, %s2669_s13  ;;  %689 = vrot.lane.b32.xlu1 %v3124_v37, %s2668_s12  ;;  %s2679_s12 = smov 127  }
 0x25d   : >> { %755 = vrot.lane.b32.xlu0 %v3136_v47, %s2669_s13  ;;  %749 = vrot.lane.b32.xlu1 %v3121_v6, %s2669_s13 }
 0x261   : >> { %815 = vrot.lane.b32.xlu0 %v3114_v35, %s2670_s16  ;;  %753 = vrot.lane.b32.xlu1 %v3095_v22, %s2669_s13 }
 0x265   : >> { %819 = vrot.lane.b32.xlu0 %v3130_v39, %s2670_s16  ;;  %757 = vrot.lane.b32.xlu1 %v3124_v37, %s2669_s13  ;;  %s2680_s13 = smov 126  }
 0x269   : >> { %823 = vrot.lane.b32.xlu0 %v3136_v47, %s2670_s16  ;;  %817 = vrot.lane.b32.xlu1 %v3121_v6, %s2670_s16 }
 0x26d   : >> { %883 = vrot.lane.b32.xlu0 %v3114_v35, %s2671_s18  ;;  %821 = vrot.lane.b32.xlu1 %v3095_v22, %s2670_s16 }
 0x271   : >> { %887 = vrot.lane.b32.xlu0 %v3130_v39, %s2671_s18  ;;  %825 = vrot.lane.b32.xlu1 %v3124_v37, %s2670_s16  ;;  %s2681_s16 = smov 116  }
 0x275   : >> { %891 = vrot.lane.b32.xlu0 %v3136_v47, %s2671_s18  ;;  %885 = vrot.lane.b32.xlu1 %v3121_v6, %s2671_s18 }
 0x279   : >> { %951 = vrot.lane.b32.xlu0 %v3114_v35, %s2672_s19  ;;  %889 = vrot.lane.b32.xlu1 %v3095_v22, %s2671_s18 }
 0x27d   : >> { %955 = vrot.lane.b32.xlu0 %v3130_v39, %s2672_s19  ;;  %893 = vrot.lane.b32.xlu1 %v3124_v37, %s2671_s18  ;;  %s2682_s18 = smov 115  }
 0x281   : >> { %959 = vrot.lane.b32.xlu0 %v3136_v47, %s2672_s19  ;;  %953 = vrot.lane.b32.xlu1 %v3121_v6, %s2672_s19 }
 0x285   : >> { %1019 = vrot.lane.b32.xlu0 %v3114_v35, %s2673_s22  ;;  %957 = vrot.lane.b32.xlu1 %v3095_v22, %s2672_s19 }
 0x289   : >> { %1023 = vrot.lane.b32.xlu0 %v3130_v39, %s2673_s22  ;;  %961 = vrot.lane.b32.xlu1 %v3124_v37, %s2672_s19  ;;  %s2683_s19 = smov 114  }
 0x28d   : >> { %1027 = vrot.lane.b32.xlu0 %v3136_v47, %s2673_s22  ;;  %1021 = vrot.lane.b32.xlu1 %v3121_v6, %s2673_s22 }
 0x291   : >> { %1087 = vrot.lane.b32.xlu0 %v3114_v35, %s2674_s25  ;;  %1025 = vrot.lane.b32.xlu1 %v3095_v22, %s2673_s22 }
 0x295   : >> { %1091 = vrot.lane.b32.xlu0 %v3130_v39, %s2674_s25  ;;  %1029 = vrot.lane.b32.xlu1 %v3124_v37, %s2673_s22 }
 0x299   : >> { %1095 = vrot.lane.b32.xlu0 %v3136_v47, %s2674_s25  ;;  %1089 = vrot.lane.b32.xlu1 %v3121_v6, %s2674_s25 }
 0x29d   : >> { %1155 = vrot.lane.b32.xlu0 %v3114_v35, %s2675_s26  ;;  %1093 = vrot.lane.b32.xlu1 %v3095_v22, %s2674_s25 }
 0x2a1   : >> { %1159 = vrot.lane.b32.xlu0 %v3130_v39, %s2675_s26  ;;  %1097 = vrot.lane.b32.xlu1 %v3124_v37, %s2674_s25  ;;  %s427_s25 = scalar_lea.vmem %s382_s20, %s2780_s9 }
 0x2a5   : >> { %1163 = vrot.lane.b32.xlu0 %v3136_v47, %s2675_s26  ;;  %1157 = vrot.lane.b32.xlu1 %v3121_v6, %s2675_s26 }
 0x2a7   : >> { %v3193_v21 = vpop.permute.xlu1 %541 }
 0x2a9   : >> { %1223 = vrot.lane.b32.xlu0 %v3114_v35, %s2677_s27  ;;  %1161 = vrot.lane.b32.xlu1 %v3095_v22, %s2675_s26 }
 0x2ab   : >> { %v3197_v16 = vpop.permute.xlu1 %543  ;;  %v3199_v0 = vpop.permute.xlu0 %551 }
 0x2ad   : >> { %1227 = vrot.lane.b32.xlu0 %v3130_v39, %s2677_s27  ;;  %1165 = vrot.lane.b32.xlu1 %v3124_v37, %s2675_s26  ;;  %s2691_s26 = smov 99  }
 0x2af   : >> { %v3203_v42 = vpop.permute.xlu1 %545  ;;  %v3205_v43 = vpop.permute.xlu0 %611 }
 0x2b1   : >> { %1231 = vrot.lane.b32.xlu0 %v3136_v47, %s2677_s27  ;;  %1225 = vrot.lane.b32.xlu1 %v3121_v6, %s2677_s27 }
 0x2b3   : >> { %v3209_v13 = vpop.permute.xlu1 %549  ;;  %v3211_v10 = vpop.permute.xlu0 %615 }
 0x2b5   : >> { %1291 = vrot.lane.b32.xlu0 %v3114_v35, %s2678_s10  ;;  %1229 = vrot.lane.b32.xlu1 %v3095_v22, %s2677_s27 }
 0x2b7   : >> { %v3215_v40 = vpop.permute.xlu1 %613  ;;  %v3217_v45 = vpop.permute.xlu0 %619 }
 0x2b9   : >> { %1295 = vrot.lane.b32.xlu0 %v3130_v39, %s2678_s10  ;;  %1233 = vrot.lane.b32.xlu1 %v3124_v37, %s2677_s27  ;;  %s2685_s27 = smov 112  }
 0x2bb   : >> { %v3221_v50 = vpop.permute.xlu1 %617  ;;  %v3223_v15 = vpop.permute.xlu0 %679 }
 0x2bd   : >> { %1299 = vrot.lane.b32.xlu0 %v3136_v47, %s2678_s10  ;;  %1293 = vrot.lane.b32.xlu1 %v3121_v6, %s2678_s10 }
 0x2bf   : >> { %v3227_v8 = vpop.permute.xlu1 %621  ;;  %v3229_v46 = vpop.permute.xlu0 %683 }
 0x2c1   : >> { %1383 = vrot.lane.b32.xlu0 %v3114_v35, %s2679_s12  ;;  %1297 = vrot.lane.b32.xlu1 %v3095_v22, %s2678_s10 }
 0x2c3   : >> { %v3233_v49 = vpop.permute.xlu1 %681  ;;  %v3235_v27 = vpop.permute.xlu0 %687 }
 0x2c5   : >> { %1387 = vrot.lane.b32.xlu0 %v3130_v39, %s2679_s12  ;;  %1301 = vrot.lane.b32.xlu1 %v3124_v37, %s2678_s10  ;;  %s2686_s10 = smov 102  }
 0x2c7   : >> { %v3239_v26 = vpop.permute.xlu1 %685  ;;  %v3241_v4 = vpop.permute.xlu0 %747 }
 0x2c9   : >> { %1391 = vrot.lane.b32.xlu0 %v3136_v47, %s2679_s12  ;;  %1385 = vrot.lane.b32.xlu1 %v3121_v6, %s2679_s12 }
 0x2cb   : >> { %v3245_v20 = vpop.permute.xlu1 %689  ;;  %v3247_v33 = vpop.permute.xlu0 %751 }
 0x2cd   : >> { %1452 = vrot.lane.b32.xlu0 %v3114_v35, %s2680_s13  ;;  %1389 = vrot.lane.b32.xlu1 %v3095_v22, %s2679_s12 }
 0x2cf   : >> { %v3251_v24 = vpop.permute.xlu1 %749  ;;  %v3253_v31 = vpop.permute.xlu0 %755 }
 0x2d1   : >> { %1458 = vrot.lane.b32.xlu0 %v3095_v22, %s2680_s13  ;;  %1393 = vrot.lane.b32.xlu1 %v3124_v37, %s2679_s12  ;;  %s2688_s12 = smov 101  }
 0x2d3   : >> { %v3257_v29 = vpop.permute.xlu1 %753  ;;  %v3259_v28 = vpop.permute.xlu0 %815 }
 0x2d5   : >> { %1456 = vrot.lane.b32.xlu0 %v3130_v39, %s2680_s13  ;;  %1454 = vrot.lane.b32.xlu1 %v3121_v6, %s2680_s13 }
 0x2d7   : >> { %v3263_v18 = vpop.permute.xlu1 %757  ;;  %v3265_v55 = vpop.permute.xlu0 %819 }
 0x2d8   : >> { %4412 = vst [vmem:[#allocation58_spill] sm:$0xff] %v3265_v55 }
 0x2d9   : >> { %1523 = vrot.lane.b32.xlu0 %v3121_v6, %s2681_s16  ;;  %1462 = vrot.lane.b32.xlu1 %v3124_v37, %s2680_s13 }
 0x2db   : >> { %v3269_v52 = vpop.permute.xlu1 %817  ;;  %v3271_v23 = vpop.permute.xlu0 %823 }
 0x2dc   : >> { %4413 = vst [vmem:[#allocation59_spill] sm:$0xff] %v3269_v52  ;;  %4414 = vst [vmem:[#allocation60_spill] sm:$0xff] %v3271_v23  ;;  %v3372_v23 = vrot.slane %v2469_v11, %v3294_v9 }
 0x2dd   : >> { %1531 = vrot.lane.b32.xlu0 %v3124_v37, %s2681_s16  ;;  %1460 = vrot.lane.b32.xlu1 %v3136_v47, %s2680_s13 }
 0x2de   : >> { %4429 = vst [vmem:[#allocation75_spill] sm:$0xff] %v3372_v23  ;;  %v563_v23 = vsel %vm553_vm1, 0.0, %v3193_v21 }
 0x2df   : >> { %v3275_v48 = vpop.permute.xlu1 %821  ;;  %v3277_v44 = vpop.permute.xlu0 %883 }
 0x2e0   : >> { %4415 = vst [vmem:[#allocation61_spill] sm:$0xff] %v3275_v48  ;;  %4416 = vst [vmem:[#allocation62_spill] sm:$0xff] %v3277_v44  ;;  %v3354_v48 = vrot.slane %v2467_v19, %v3294_v9 }
 0x2e1   : >> { %1525 = vrot.lane.b32.xlu0 %v3130_v39, %s2681_s16  ;;  %1527 = vrot.lane.b32.xlu1 %v3095_v22, %s2681_s16 }
 0x2e3   : >> { %v3281_v38 = vpop.permute.xlu1 %825  ;;  %v3283_v36 = vpop.permute.xlu0 %887 }
 0x2e4   : >> { %4417 = vst [vmem:[#allocation63_spill] sm:$0xff] %v3281_v38  ;;  %4418 = vst [vmem:[#allocation64_spill] sm:$0xff] %v3283_v36  ;;  %v3338_v36 = vrot.slane %v2465_v14, %v3296_v30  ;;  %v3341_v38 = vrot.slane %v2466_v5, %v3294_v9 }
 0x2e5   : >> { %1592 = vrot.lane.b32.xlu0 %v3121_v6, %s2682_s18  ;;  %1521 = vrot.lane.b32.xlu1 %v3114_v35, %s2681_s16 }
 0x2e7   : >> { %v3288_v34 = vpop.permute.xlu1 %885  ;;  %v3290_v32 = vpop.permute.xlu0 %891 }
 0x2e8   : >> { %4419 = vst [vmem:[#allocation65_spill] sm:$0xff] %v3288_v34  ;;  %4420 = vst [vmem:[#allocation66_spill] sm:$0xff] %v3290_v32  ;;  %v3330_v32 = vrot.slane %v2465_v14, %v3294_v9  ;;  %v2470_v34 = vld [vmem:[%s4270_s6 + $0x6] ss:$8 sm:$0x3]  ;;  %v3357_v14 = vrot.slane %v2467_v19, %v3296_v30  ;;  %v3375_v19 = vrot.slane %v2469_v11, %v3296_v30  ;;  %v633_v11 = vsel %vm623_vm2, 0.0, %v3205_v43 }
 0x2e9   : >> { %1600 = vrot.lane.b32.xlu0 %v3124_v37, %s2682_s18  ;;  %1529 = vrot.lane.b32.xlu1 %v3136_v47, %s2681_s16  ;;  %v3378_v63 = vrot.slane %v2470_v34, %v3294_v9 }
 0x2ea   : >> { %4426 = vst [vmem:[#allocation72_spill] sm:$0xff] %v3357_v14  ;;  %4430 = vst [vmem:[#allocation76_spill] sm:$0xff] %v3375_v19  ;;  %v3398_v19 = vrot.slane %v2471_v62, %v3296_v30 }
 0x2eb   : >> { %v3305_v3 = vpop.permute.xlu1 %889  ;;  %v3307_v25 = vpop.permute.xlu0 %951  ;;  %4431 = vst [vmem:[#allocation77_spill] sm:$0xff] %v3378_v63  ;;  %v3395_v63 = vrot.slane %v2471_v62, %v3294_v9  ;;  %v555_v62 = vsel %vm553_vm1, %v3203_v42, %v3191_v17  ;;  %v634_v17 = vsel %vm623_vm2, 0.0, %v3211_v10 }
 0x2ec   : >> { %4422 = vst [vmem:[#allocation68_spill] sm:$0xff] %v3305_v3  ;;  %4423 = vst [vmem:[#allocation69_spill] sm:$0xff] %v3307_v25  ;;  %v3324_v25 = vrot.slane %v566_v41, %v3294_v9  ;;  %v3327_v3 = vrot.slane %v566_v41, %v3296_v30  ;;  %v3344_v41 = vrot.slane %v2466_v5, %v3296_v30 }
 0x2ed   : >> { %1594 = vrot.lane.b32.xlu0 %v3130_v39, %s2682_s18  ;;  %1596 = vrot.lane.b32.xlu1 %v3095_v22, %s2682_s18  ;;  %v3363_v5 = vrot.slane %v2468_v1, %v3296_v30  ;;  %v3383_v1 = vrot.slane %v2470_v34, %v3296_v30  ;;  %4433 = vst [vmem:[#allocation79_spill] sm:$0xff] %v3395_v63  ;;  %4434 = vst [vmem:[#allocation80_spill] sm:$0xff] %v3398_v19 }
 0x2ee   : >> { %v554_v34 = vsel %vm553_vm1, %v3193_v21, %v3197_v16  ;;  %v564_v21 = vsel %vm553_vm1, 0.0, %v3203_v42  ;;  %v624_v42 = vsel %vm623_vm2, %v3205_v43, %v3215_v40  ;;  %v581_v43 = vmul.f32 %v3327_v3, %v555_v62 }
 0x2ef   : >> { %v3346_v7 = vpop.permute.xlu1 %893  ;;  %v3348_v44 = vpop.permute.xlu0 %955  ;;  %4428 = vst [vmem:[#allocation74_spill] sm:$0xff] %v3363_v5  ;;  %4432 = vst [vmem:[#allocation78_spill] sm:$0xff] %v3383_v1  ;;  %v2474_v5 = vld [vmem:[%s4270_s6 + $0x12] ss:$8 sm:$0x3]  ;;  %v625_v40 = vsel %vm623_vm2, %v3211_v10, %v3221_v50  ;;  %v701_v62 = vsel %vm691_vm3, 0.0, %v3223_v15 }
 0x2f0   : >> { %4424 = vst [vmem:[#allocation70_spill] sm:$0xff] %v3346_v7  ;;  %4425 = vst [vmem:[#allocation71_spill] sm:$0xff] %v3348_v44  ;;  %v2472_v44 = vld [vmem:[%s4270_s6 + $0x10] ss:$8 sm:$0x3]  ;;  %v3425_v19 = vrot.slane %v2474_v5, %v3294_v9 }
 0x2f1   : >> { %v2473_v7 = vld [vmem:[%s4270_s6 + $0x11] ss:$8 sm:$0x3]  ;;  %1661 = vrot.lane.b32.xlu0 %v3121_v6, %s2683_s19  ;;  %1590 = vrot.lane.b32.xlu1 %v3114_v35, %s2682_s18  ;;  %v3408_v52 = vrot.slane %v2472_v44, %v3294_v9  ;;  %v3411_v55 = vrot.slane %v2472_v44, %v3296_v30  ;;  %v2475_v44 = vld [vmem:[%s4270_s6 + $0x13] ss:$8 sm:$0x3] }
 0x2f2   : >> { %v3414_v14 = vrot.slane %v2473_v7, %v3294_v9  ;;  %v3422_v16 = vrot.slane %v2473_v7, %v3296_v30  ;;  %4439 = vst [vmem:[#allocation85_spill] sm:$0xff] %v3425_v19  ;;  %v579_v7 = vmul.f32 %v3327_v3, %v554_v34  ;;  %v580_v19 = vmul.f32 %v3324_v25, %v564_v21 }
 0x2f3   : >> { %v3403_v1 = vpop.permute.xlu1 %953  ;;  %v3405_v2 = vpop.permute.xlu0 %959  ;;  %4435 = vst [vmem:[#allocation81_spill] sm:$0xff] %v3408_v52  ;;  %4436 = vst [vmem:[#allocation82_spill] sm:$0xff] %v3411_v55  ;;  %v578_v55 = vmul.f32 %v3324_v25, %v563_v23  ;;  %v635_v23 = vsel %vm623_vm2, 0.0, %v3217_v45  ;;  %v3459_v63 = vrot.slane %v2475_v44, %v3294_v9  ;;  %v650_v21 = vmul.f32 %v3338_v36, %v624_v42 }
 0x2f4   : >> { %4437 = vst [vmem:[#allocation83_spill] sm:$0xff] %v3414_v14  ;;  %4438 = vst [vmem:[#allocation84_spill] sm:$0xff] %v3422_v16  ;;  %v649_v14 = vmul.f32 %v3330_v32, %v633_v11  ;;  %v565_v16 = vsel %vm553_vm1, 0.0, %v3209_v13  ;;  %v3447_v11 = vrot.slane %v2474_v5, %v3296_v30  ;;  %v556_v5 = vsel %vm553_vm1, %v3209_v13, %v3199_v0 }
 0x2f5   : >> { %1669 = vrot.lane.b32.xlu0 %v3124_v37, %s2683_s19  ;;  %1598 = vrot.lane.b32.xlu1 %v3136_v47, %s2682_s18  ;;  %v599_v10 = vmul.f32 %v2908_v51, %v578_v55  ;;  %v653_v9 = vmul.f32 %v3330_v32, %v635_v23  ;;  %v600_v0 = vmul.f32 %v2908_v51, %v579_v7  ;;  %s2684_s18 = smov 113   ;;  %vm1464_vm1 = vcmask 1031168  }
 0x2f6   : >> { %4440 = vst [vmem:[#allocation86_spill] sm:$0xff] %v3447_v11  ;;  %v651_v11 = vmul.f32 %v3330_v32, %v634_v17  ;;  %v667_v50 = vmul.f32 %v2922_v56, %v649_v14  ;;  %v652_v13 = vmul.f32 %v3338_v36, %v625_v40  ;;  %v3479_v17 = vrot.slane %v2475_v44, %v3296_v30 }
 0x2f7   : >> { %v3454_v34 = vpop.permute.xlu1 %957  ;;  %v3456_v52 = vpop.permute.xlu0 %1019  ;;  %v601_v55 = vmul.f32 %v3107_v12, %v580_v19  ;;  %v717_v32 = vmul.f32 %v3341_v38, %v701_v62  ;;  %v626_v14 = vsel %vm623_vm2, %v3217_v45, %v3227_v8  ;;  %v602_v42 = vmul.f32 %v3107_v12, %v581_v43 }
 0x2f8   : >> { %4441 = vst [vmem:[#allocation87_spill] sm:$0xff] %v3456_v52  ;;  %v582_v52 = vmul.f32 %v3324_v25, %v565_v16  ;;  %v583_v25 = vmul.f32 %v3327_v3, %v556_v5  ;;  %v669_v7 = vmul.f32 %v2917_v54, %v651_v11  ;;  %v668_v44 = vmul.f32 %v2922_v56, %v650_v21 }
 0x2f9   : >> { %1663 = vrot.lane.b32.xlu0 %v3130_v39, %s2683_s19  ;;  %1665 = vrot.lane.b32.xlu1 %v3095_v22, %s2683_s19  ;;  %v702_v19 = vsel %vm691_vm3, 0.0, %v3229_v46  ;;  %v673_v3 = vadd.f32 %v667_v50, %v599_v10  ;;  %v671_v40 = vmul.f32 %v2924_v57, %v653_v9  ;;  %v692_v45 = vsel %vm691_vm3, %v3223_v15, %v3233_v49 }
 0x2fa   : >> { %v603_v23 = vmul.f32 %v2912_v53, %v582_v52  ;;  %v670_v12 = vmul.f32 %v2917_v54, %v652_v13  ;;  %v654_v56 = vmul.f32 %v3338_v36, %v626_v14  ;;  %v703_v8 = vsel %vm691_vm3, 0.0, %v3235_v27 }
 0x2fb   : >> { %v3487_v51 = vpop.permute.xlu1 %961  ;;  %v3489_v16 = vpop.permute.xlu0 %1023  ;;  %v693_v52 = vsel %vm691_vm3, %v3229_v46, %v3239_v26  ;;  %v604_v9 = vmul.f32 %v2912_v53, %v583_v25  ;;  %v735_v15 = vmul.f32 %v2930_v58, %v717_v32  ;;  %v719_v49 = vmul.f32 %v3341_v38, %v702_v19 }
 0x2fc   : >> { %v769_v54 = vsel %vm759_vm4, 0.0, %v3241_v4  ;;  %v675_v43 = vadd.f32 %v669_v7, %v601_v55  ;;  %v674_v5 = vadd.f32 %v668_v44, %v600_v0  ;;  %v718_v26 = vmul.f32 %v3344_v41, %v692_v45 }
 0x2fd   : >> { %1730 = vrot.lane.b32.xlu0 %v3121_v6, %s2684_s18  ;;  %1659 = vrot.lane.b32.xlu1 %v3114_v35, %s2683_s19  ;;  %v694_v46 = vsel %vm691_vm3, %v3235_v27, %v3245_v20  ;;  %v677_v53 = vadd.f32 %v671_v40, %v603_v23  ;;  %v721_v21 = vmul.f32 %v3341_v38, %v703_v8  ;;  %v770_v10 = vsel %vm759_vm4, 0.0, %v3247_v33 }
 0x2fe   : >> { %v720_v62 = vmul.f32 %v3344_v41, %v693_v52  ;;  %v676_v50 = vadd.f32 %v670_v12, %v602_v42  ;;  %v672_v0 = vmul.f32 %v2924_v57, %v654_v56  ;;  %v785_v13 = vmul.f32 %v3354_v48, %v769_v54  ;;  %v4445_v52 = vld [vmem:[#allocation3_spill] sm:$0xff] }
 0x2ff   : >> { %v3517_v36 = vpop.permute.xlu1 %1021  ;;  %v3519_v11 = vpop.permute.xlu0 %1027  ;;  %v741_v20 = vadd.f32 %v735_v15, %v673_v3  ;;  %v737_v38 = vmul.f32 %v2932_v59, %v719_v49  ;;  %v722_v27 = vmul.f32 %v3344_v41, %v694_v46  ;;  %v760_v55 = vsel %vm759_vm4, %v3241_v4, %v3251_v24  ;;  %v4442_v3 = vld [vmem:[#allocation72_spill] sm:$0xff]  ;;  %v4446_v15 = vld [vmem:[#allocation73_spill] sm:$0xff] }
 0x300   : >> { %v736_v57 = vmul.f32 %v2930_v58, %v718_v26  ;;  %v787_v14 = vmul.f32 %v3354_v48, %v770_v10  ;;  %v771_v42 = vsel %vm759_vm4, 0.0, %v3253_v31  ;;  %v761_v7 = vsel %vm759_vm4, %v3247_v33, %v3257_v29  ;;  %v4443_v29 = vld [vmem:[#allocation58_spill] sm:$0xff]  ;;  %v4448_v10 = vld [vmem:[#allocation60_spill] sm:$0xff] }
 0x301   : >> { %1738 = vrot.lane.b32.xlu0 %v3124_v37, %s2684_s18  ;;  %1667 = vrot.lane.b32.xlu1 %v3136_v47, %s2683_s19  ;;  %v739_v41 = vmul.f32 %v2937_v61, %v721_v21  ;;  %v738_v44 = vmul.f32 %v2932_v59, %v720_v62  ;;  %v837_v24 = vsel %vm827_vm5, 0.0, %v3259_v28  ;;  %v762_v58 = vsel %vm759_vm4, %v3253_v31, %v3263_v18  ;;  %v4444_v18 = vld [vmem:[#allocation59_spill] sm:$0xff]  ;;  %v4447_v62 = vld [vmem:[#allocation74_spill] sm:$0xff] }
 0x302   : >> { %v678_v4 = vadd.f32 %v672_v0, %v604_v9  ;;  %v803_v19 = vmul.f32 %v2935_v60, %v785_v13  ;;  %v786_v23 = vmul.f32 %v4442_v3, %v760_v55  ;;  %v838_v33 = vsel %vm827_vm5, 0.0, %v4443_v29 }
 0x303   : >> { %v3540_v25 = vpop.permute.xlu1 %1025  ;;  %v3542_v32 = vpop.permute.xlu0 %1087  ;;  %v740_v59 = vmul.f32 %v2937_v61, %v722_v27  ;;  %v789_v40 = vmul.f32 %v3354_v48, %v771_v42  ;;  %v788_v31 = vmul.f32 %v4442_v3, %v761_v7  ;;  %v828_v45 = vsel %vm827_vm5, %v3259_v28, %v4444_v18  ;;  %v4452_v7 = vld [vmem:[#allocation62_spill] sm:$0xff] }
 0x304   : >> { %v743_v8 = vadd.f32 %v737_v38, %v675_v43  ;;  %v805_v9 = vmul.f32 %v4445_v52, %v787_v14  ;;  %v853_v49 = vmul.f32 %v4446_v15, %v837_v24  ;;  %v790_v61 = vmul.f32 %v4442_v3, %v762_v58  ;;  %v4450_v38 = vld [vmem:[#allocation61_spill] sm:$0xff]  ;;  %v4455_v3 = vld [vmem:[#allocation64_spill] sm:$0xff] }
 0x305   : >> { %1732 = vrot.lane.b32.xlu0 %v3130_v39, %s2684_s18  ;;  %1734 = vrot.lane.b32.xlu1 %v3095_v22, %s2684_s18  ;;  %v742_v54 = vadd.f32 %v736_v57, %v674_v5  ;;  %v745_v48 = vadd.f32 %v739_v41, %v677_v53  ;;  %v744_v26 = vadd.f32 %v738_v44, %v676_v50  ;;  %v839_v0 = vsel %vm827_vm5, 0.0, %v4448_v10  ;;  %v4449_v53 = vld [vmem:[#allocation5_spill] sm:$0xff]  ;;  %v4451_v57 = vld [vmem:[#allocation2_spill] sm:$0xff]  ;;  %v4453_v44 = vld [vmem:[#allocation7_spill] sm:$0xff] }
 0x306   : >> { %v855_v46 = vmul.f32 %v4446_v15, %v838_v33  ;;  %v809_v28 = vadd.f32 %v803_v19, %v741_v20  ;;  %v804_v21 = vmul.f32 %v2935_v60, %v786_v23  ;;  %v854_v43 = vmul.f32 %v4447_v62, %v828_v45 }
 0x307   : >> { %v3572_v12 = vpop.permute.xlu1 %1029  ;;  %v3574_v56 = vpop.permute.xlu0 %1091  ;;  %v746_v5 = vadd.f32 %v740_v59, %v678_v4  ;;  %v807_v50 = vmul.f32 %v4449_v53, %v789_v40  ;;  %v806_v13 = vmul.f32 %v4445_v52, %v788_v31  ;;  %v829_v20 = vsel %vm827_vm5, %v4443_v29, %v4450_v38  ;;  %v4454_v4 = vld [vmem:[#allocation63_spill] sm:$0xff]  ;;  %v4456_v40 = vld [vmem:[#allocation65_spill] sm:$0xff] }
 0x308   : >> { %v811_v55 = vadd.f32 %v805_v9, %v743_v8  ;;  %v871_v14 = vmul.f32 %v4451_v57, %v853_v49  ;;  %v808_v42 = vmul.f32 %v4449_v53, %v790_v61  ;;  %v905_v41 = vsel %vm895_vm6, 0.0, %v4452_v7  ;;  %v4457_v8 = vld [vmem:[#allocation75_spill] sm:$0xff]  ;;  %v4458_v9 = vld [vmem:[#allocation66_spill] sm:$0xff] }
 0x309   : >> { %1799 = vrot.lane.b32.xlu0 %v3121_v6, %s2685_s27  ;;  %1728 = vrot.lane.b32.xlu1 %v3114_v35, %s2684_s18  ;;  %v873_v24 = vmul.f32 %v4453_v44, %v855_v46  ;;  %v857_v58 = vmul.f32 %v4446_v15, %v839_v0  ;;  %v830_v19 = vsel %vm827_vm5, %v4448_v10, %v4454_v4  ;;  %v906_v23 = vsel %vm895_vm6, 0.0, %v4455_v3  ;;  %v4460_v0 = vld [vmem:[#allocation9_spill] sm:$0xff] }
 0x30a   : >> { %v810_v29 = vadd.f32 %v804_v21, %v742_v54  ;;  %v872_v33 = vmul.f32 %v4451_v57, %v854_v43  ;;  %v856_v59 = vmul.f32 %v4447_v62, %v829_v20  ;;  %v896_v31 = vsel %vm895_vm6, %v4452_v7, %v4456_v40  ;;  %v4459_v43 = vld [vmem:[#allocation68_spill] sm:$0xff]  ;;  %v4462_v20 = vld [vmem:[#allocation69_spill] sm:$0xff] }
 0x30b   : >> { %v3593_v27 = vpop.permute.xlu1 %1089  ;;  %v3595_v60 = vpop.permute.xlu0 %1095  ;;  %v813_v18 = vadd.f32 %v807_v50, %v745_v48  ;;  %v812_v45 = vadd.f32 %v806_v13, %v744_v26  ;;  %v921_v52 = vmul.f32 %v4457_v8, %v905_v41  ;;  %v907_v15 = vsel %vm895_vm6, 0.0, %v4458_v9  ;;  %v4461_v50 = vld [vmem:[#allocation76_spill] sm:$0xff]  ;;  %v4465_v41 = vld [vmem:[#allocation71_spill] sm:$0xff] }
 0x30c   : >> { %v877_v54 = vadd.f32 %v871_v14, %v809_v28  ;;  %v858_v46 = vmul.f32 %v4447_v62, %v830_v19  ;;  %v923_v21 = vmul.f32 %v4457_v8, %v906_v23  ;;  %v897_v10 = vsel %vm895_vm6, %v4455_v3, %v4459_v43  ;;  %v4466_v19 = vld [vmem:[#allocation11_spill] sm:$0xff] }
 0x30d   : >> { %1807 = vrot.lane.b32.xlu0 %v3124_v37, %s2685_s27  ;;  %1736 = vrot.lane.b32.xlu1 %v3136_v47, %s2684_s18  ;;  %v814_v48 = vadd.f32 %v808_v42, %v746_v5  ;;  %v879_v26 = vadd.f32 %v873_v24, %v811_v55  ;;  %v875_v53 = vmul.f32 %v4460_v0, %v857_v58  ;;  %v973_v57 = vsel %vm963_vm7, 0.0, %v4462_v20  ;;  %v4463_v5 = vld [vmem:[#allocation4_spill] sm:$0xff]  ;;  %v4464_v42 = vld [vmem:[#allocation70_spill] sm:$0xff]  ;;  %s2692_s18 = smov 98  }
 0x30e   : >> { %v922_v13 = vmul.f32 %v4461_v50, %v896_v31  ;;  %v878_v38 = vadd.f32 %v872_v33, %v810_v29  ;;  %v874_v28 = vmul.f32 %v4453_v44, %v856_v59  ;;  %v925_v62 = vmul.f32 %v4457_v8, %v907_v15  ;;  %v4467_v59 = vld [vmem:[#allocation77_spill] sm:$0xff]  ;;  %v4468_v8 = vld [vmem:[#allocation87_spill] sm:$0xff] }
 0x30f   : >> { %v3620_v49 = vpop.permute.xlu1 %1093  ;;  %v3622_v61 = vpop.permute.xlu0 %1155  ;;  %v939_v55 = vmul.f32 %v4463_v5, %v921_v52  ;;  %v924_v14 = vmul.f32 %v4461_v50, %v897_v10  ;;  %v898_v7 = vsel %vm895_vm6, %v4458_v9, %v4464_v42  ;;  %v974_v44 = vsel %vm963_vm7, 0.0, %v4465_v41 }
 0x310   : >> { %v876_v4 = vmul.f32 %v4460_v0, %v858_v46  ;;  %v941_v3 = vmul.f32 %v4466_v19, %v923_v21  ;;  %v964_v23 = vsel %vm963_vm7, %v4462_v20, %v3403_v1  ;;  %v975_v29 = vsel %vm963_vm7, 0.0, %v3405_v2  ;;  %v4469_v1 = vld [vmem:[#allocation13_spill] sm:$0xff] }
 0x311   : >> { %1801 = vrot.lane.b32.xlu0 %v3130_v39, %s2685_s27  ;;  %1803 = vrot.lane.b32.xlu1 %v3095_v22, %s2685_s27  ;;  %v940_v33 = vmul.f32 %v4463_v5, %v922_v13  ;;  %v989_v40 = vmul.f32 %v4467_v59, %v973_v57  ;;  %v965_v31 = vsel %vm963_vm7, %v4465_v41, %v3454_v34  ;;  %v1041_v52 = vsel %vm1031_vm8, 0.0, %v4468_v8  ;;  %v4470_v34 = vld [vmem:[#allocation78_spill] sm:$0xff]  ;;  %v4471_v57 = vld [vmem:[#allocation79_spill] sm:$0xff] }
 0x312   : >> { %v881_v9 = vadd.f32 %v875_v53, %v813_v18  ;;  %v943_v15 = vmul.f32 %v4469_v1, %v925_v62  ;;  %v926_v46 = vmul.f32 %v4461_v50, %v898_v7  ;;  %v991_v21 = vmul.f32 %v4467_v59, %v974_v44  ;;  %v4472_v41 = vld [vmem:[#allocation6_spill] sm:$0xff] }
 0x313   : >> { %v3646_v24 = vpop.permute.xlu1 %1097  ;;  %v3648_v58 = vpop.permute.xlu0 %1159  ;;  %v942_v43 = vmul.f32 %v4466_v19, %v924_v14  ;;  %v990_v10 = vmul.f32 %v4470_v34, %v964_v23  ;;  %v993_v0 = vmul.f32 %v4467_v59, %v975_v29  ;;  %v966_v13 = vsel %vm963_vm7, %v3405_v2, %v3487_v51  ;;  %v4473_v51 = vld [vmem:[#allocation15_spill] sm:$0xff]  ;;  %v4475_v29 = vld [vmem:[#allocation8_spill] sm:$0xff] }
 0x314   : >> { %v880_v50 = vadd.f32 %v874_v28, %v812_v45  ;;  %v945_v62 = vadd.f32 %v939_v55, %v877_v54  ;;  %v992_v20 = vmul.f32 %v4470_v34, %v965_v31  ;;  %v1057_v5 = vmul.f32 %v4471_v57, %v1041_v52  ;;  %v4474_v28 = vld [vmem:[#allocation17_spill] sm:$0xff] }
 0x315   : >> { %1868 = vrot.lane.b32.xlu0 %v3121_v6, %s2686_s10  ;;  %1797 = vrot.lane.b32.xlu1 %v3114_v35, %s2685_s27  ;;  %v882_v42 = vadd.f32 %v876_v4, %v814_v48  ;;  %v947_v14 = vadd.f32 %v941_v3, %v879_v26  ;;  %v946_v7 = vadd.f32 %v940_v33, %v878_v38  ;;  %v1042_v54 = vsel %vm1031_vm8, 0.0, %v3489_v16 }
 0x316   : >> { %v1007_v44 = vmul.f32 %v4472_v41, %v989_v40  ;;  %v944_v2 = vmul.f32 %v4469_v1, %v926_v46  ;;  %v1009_v19 = vmul.f32 %v4473_v51, %v991_v21  ;;  %v994_v45 = vmul.f32 %v4470_v34, %v966_v13 }
 0x317   : >> { %v3677_v18 = vpop.permute.xlu1 %1157  ;;  %v3679_v53 = vpop.permute.xlu0 %1163  ;;  %v949_v48 = vadd.f32 %v943_v15, %v881_v9  ;;  %v948_v26 = vadd.f32 %v942_v43, %v880_v50  ;;  %v1008_v38 = vmul.f32 %v4472_v41, %v990_v10  ;;  %v1011_v55 = vmul.f32 %v4474_v28, %v993_v0  ;;  %v3716_v15 = vld [vmem:[%s2817_s21 + $0x8] sm:$0xff]  ;;  %v4477_v50 = vld [vmem:[#allocation81_spill] sm:$0xff] }
 0x318   : >> { %v1010_v23 = vmul.f32 %v4473_v51, %v992_v20  ;;  %v1075_v33 = vmul.f32 %v4475_v29, %v1057_v5  ;;  %v1032_v59 = vsel %vm1031_vm8, %v4468_v8, %v3517_v36  ;;  %v1043_v40 = vsel %vm1031_vm8, 0.0, %v3519_v11 }
 0x319   : >> { %1876 = vrot.lane.b32.xlu0 %v3124_v37, %s2686_s10  ;;  %1805 = vrot.lane.b32.xlu1 %v3136_v47, %s2685_s27  ;;  %v1059_v31 = vmul.f32 %v4471_v57, %v1042_v54  ;;  %v1033_v52 = vsel %vm1031_vm8, %v3489_v16, %v3540_v25  ;;  %v1109_v9 = vsel %vm1099_vm9, 0.0, %v3542_v32  ;;  %v1034_v1 = vsel %vm1031_vm8, %v3519_v11, %v3572_v12  ;;  %v4476_v16 = vld [vmem:[#allocation80_spill] sm:$0xff]  ;;  %s2305_s27 = scalar_lea.vmem %s2771_s29, %s2792_s15 }
 0x31a   : >> { %v1013_v36 = vadd.f32 %v1007_v44, %v945_v62  ;;  %v950_v8 = vadd.f32 %v944_v2, %v882_v42  ;;  %v1015_v46 = vadd.f32 %v1009_v19, %v947_v14  ;;  %v1012_v21 = vmul.f32 %v4474_v28, %v994_v45  ;;  %v4478_v14 = vld [vmem:[#allocation19_spill] sm:$0xff]  ;;  %v3743_v19 = vld [vmem:[%s2817_s21] sm:$0xff] }
 0x31b   : >> { %v3695_v4 = vpop.permute.xlu1 %1161  ;;  %v3697_v3 = vpop.permute.xlu0 %1223  ;;  %v1058_v25 = vmul.f32 %v4476_v16, %v1032_v59  ;;  %v1061_v43 = vmul.f32 %v4471_v57, %v1043_v40  ;;  %v1110_v34 = vsel %vm1099_vm9, 0.0, %v3574_v56  ;;  %v1111_v11 = vsel %vm1099_vm9, 0.0, %v3595_v60  ;;  %v4480_v59 = vld [vmem:[#allocation10_spill] sm:$0xff] }
 0x31c   : >> { %v1014_v0 = vadd.f32 %v1008_v38, %v946_v7  ;;  %v1060_v13 = vmul.f32 %v4476_v16, %v1033_v52  ;;  %v1125_v62 = vmul.f32 %v4477_v50, %v1109_v9  ;;  %v1062_v20 = vmul.f32 %v4476_v16, %v1034_v1  ;;  %v4481_v9 = vld [vmem:[#allocation83_spill] sm:$0xff] }
 0x31d   : >> { %2054 = vperm.xlu0 %2606, %v3716_v15   ;;  %1872 = vrot.lane.b32.xlu1 %v3095_v22, %s2686_s10  ;;  %v1017_v5 = vadd.f32 %v1011_v55, %v949_v48  ;;  %v1016_v57 = vadd.f32 %v1010_v23, %v948_v26  ;;  %v1081_v42 = vadd.f32 %v1075_v33, %v1013_v36  ;;  %v1178_v7 = vsel %vm1167_vm10, 0.0, %v3648_v58  ;;  %v4479_v48 = vld [vmem:[#allocation21_spill] sm:$0xff]  ;;  %v4482_v36 = vld [vmem:[#allocation23_spill] sm:$0xff] }
 0x31e   : >> { %v1077_v41 = vmul.f32 %v4478_v14, %v1059_v31  ;;  %v1018_v44 = vadd.f32 %v1012_v21, %v950_v8  ;;  %v1127_v2 = vmul.f32 %v4477_v50, %v1110_v34  ;;  %v1129_v51 = vmul.f32 %v4477_v50, %v1111_v11  ;;  %v4483_v21 = vld [vmem:[#allocation82_spill] sm:$0xff]  ;;  %v4485_v11 = vld [vmem:[#allocation85_spill] sm:$0xff] }
 0x31f   : >> { %v3728_v12 = vpop.permute.xlu1 %1165  ;;  %v3730_v10 = vpop.permute.xlu0 %1227  ;;  %v2687_v45 = vmov 23   ;;  %v1076_v54 = vmul.f32 %v4475_v29, %v1058_v25  ;;  %v1079_v26 = vmul.f32 %v4479_v48, %v1061_v43  ;;  %v1100_v38 = vsel %vm1099_vm9, %v3542_v32, %v3593_v27  ;;  %v4484_v25 = vld [vmem:[#allocation25_spill] sm:$0xff] }
 0x320   : >> { %v1179_v28 = vsel %vm1167_vm10, 0.0, %v3679_v53  ;;  %v1078_v33 = vmul.f32 %v4478_v14, %v1060_v13  ;;  %v1143_v40 = vmul.f32 %v4480_v59, %v1125_v62  ;;  %v1080_v29 = vmul.f32 %v4479_v48, %v1062_v20 }
 0x321   : >> { %1870 = vrot.lane.b32.xlu0 %v3130_v39, %s2686_s10  ;;  %2050 = vperm.xlu1 %2605, %v3743_v19   ;;  %v1246_v31 = vsel %vm1235_vm11, 0.0, %v3730_v10  ;;  %v1101_v32 = vsel %vm1099_vm9, %v3574_v56, %v3620_v49  ;;  %v1177_v27 = vsel %vm1167_vm10, 0.0, %v3622_v61  ;;  %v1102_v52 = vsel %vm1099_vm9, %v3595_v60, %v3646_v24  ;;  %v3776_v49 = vld [vmem:[%s2817_s21 + $0x10] sm:$0xff]  ;;  %s2690_s21 = smov 100  }
 0x322   : >> { %2608 = vset.pattern.permute.xlu0 %v2687_v45  ;;  %v1195_v1 = vmul.f32 %v4481_v9, %v1178_v7  ;;  %v1145_v8 = vmul.f32 %v4482_v36, %v1127_v2  ;;  %v1126_v16 = vmul.f32 %v4483_v21, %v1100_v38  ;;  %v1147_v43 = vmul.f32 %v4484_v25, %v1129_v51  ;;  %v4487_v38 = vld [vmem:[#allocation29_spill] sm:$0xff] }
 0x323   : >> { %v1226_v55 = vpop.permute.xlu1 %1225  ;;  %v3753_v23 = vpop.permute.xlu0 %1231  ;;  %v1197_v56 = vmul.f32 %v4481_v9, %v1179_v28  ;;  %v1083_v34 = vadd.f32 %v1077_v41, %v1015_v46  ;;  %v3779_v60 = vadd.f32 %v1076_v54, %v1014_v0  ;;  %v1085_v24 = vadd.f32 %v1079_v26, %v1017_v5  ;;  %v4486_v0 = vld [vmem:[#allocation27_spill] sm:$0xff] }
 0x324   : >> { %v1263_v13 = vmul.f32 %v4485_v11, %v1246_v31  ;;  %v1128_v62 = vmul.f32 %v4483_v21, %v1101_v32  ;;  %v1193_v20 = vmul.f32 %v4481_v9, %v1177_v27  ;;  %v1130_v14 = vmul.f32 %v4483_v21, %v1102_v52  ;;  %v4489_v31 = vld [vmem:[#allocation12_spill] sm:$0xff] }
 0x325   : >> { %1937 = vrot.lane.b32.xlu0 %v3121_v6, %s2688_s12  ;;  %2058 = vperm.xlu1 %2605, %v3776_v49   ;;  %v1247_v2 = vsel %vm1235_vm11, 0.0, %v3753_v23  ;;  %v1084_v7 = vadd.f32 %v1078_v33, %v1016_v57  ;;  %v3787_v48 = vadd.f32 %v1143_v40, %v1081_v42  ;;  %v3789_v46 = vadd.f32 %v1080_v29, %v1018_v44  ;;  %v4488_v44 = vld [vmem:[#allocation30_spill] sm:$0xff] }
 0x326   : >> { %v1213_v5 = vmul.f32 %v4486_v0, %v1195_v1  ;;  %v1151_v41 = vadd.f32 %v1145_v8, %v1083_v34  ;;  %v1144_v54 = vmul.f32 %v4480_v59, %v1126_v16  ;;  %v1153_v26 = vadd.f32 %v1147_v43, %v1085_v24 }
 0x327   : >> { %v1292_v50 = vpop.permute.xlu0 %1291  ;;  %v1230_v51 = vpop.permute.xlu1 %1229  ;;  %v1215_v28 = vmul.f32 %v4487_v38, %v1197_v56  ;;  %v1168_v57 = vsel %vm1167_vm10, %v3622_v61, %v3677_v18  ;;  %v1169_v42 = vsel %vm1167_vm10, %v3648_v58, %v3695_v4  ;;  %v1281_v33 = vmul.f32 %v4488_v44, %v1263_v13  ;;  %v4492_v56 = vld [vmem:[#allocation32_spill] sm:$0xff] }
 0x328   : >> { %v1265_v40 = vmul.f32 %v4485_v11, %v1247_v2  ;;  %v1146_v59 = vmul.f32 %v4482_v36, %v1128_v62  ;;  %v1211_v32 = vmul.f32 %v4489_v31, %v1193_v20  ;;  %v1148_v27 = vmul.f32 %v4484_v25, %v1130_v14  ;;  %v4491_v25 = vld [vmem:[#allocation31_spill] sm:$0xff]  ;;  %v4493_v62 = vld [vmem:[#allocation86_spill] sm:$0xff] }
 0x329   : >> { %1945 = vrot.lane.b32.xlu0 %v3124_v37, %s2688_s12  ;;  %1866 = vrot.lane.b32.xlu1 %v3114_v35, %s2686_s10  ;;  %v1219_v61 = vadd.f32 %v1213_v5, %v1151_v41  ;;  %v1245_v18 = vsel %vm1235_vm11, 0.0, %v3697_v3  ;;  %v1237_v58 = vsel %vm1235_vm11, %v3730_v10, %v1230_v51  ;;  %v1221_v36 = vadd.f32 %v1215_v28, %v1153_v26 }
 0x32a   : >> { %2607 = vset.pattern.permute.xlu1 %v2687_v45  ;;  %v4490_v45 = vld [vmem:[#allocation84_spill] sm:$0xff]  ;;  %v1170_v21 = vsel %vm1167_vm10, %v3679_v53, %v3728_v12  ;;  %v1236_v10 = vsel %vm1235_vm11, %v3697_v3, %v1226_v55  ;;  %v1283_v43 = vmul.f32 %v4491_v25, %v1265_v40  ;;  %v1261_v13 = vmul.f32 %v4485_v11, %v1245_v18 }
 0x32b   : >> { %v1296_v29 = vpop.permute.xlu0 %1295  ;;  %v1234_v52 = vpop.permute.xlu1 %1233  ;;  %v1194_v1 = vmul.f32 %v4490_v45, %v1168_v57  ;;  %v1196_v8 = vmul.f32 %v4490_v45, %v1169_v42  ;;  %v1287_v16 = vadd.f32 %v1281_v33, %v1219_v61  ;;  %v1264_v20 = vmul.f32 %v4493_v62, %v1237_v58  ;;  %v4494_v57 = vld [vmem:[#allocation33_spill] sm:$0xff]  ;;  %v4495_v58 = vld [vmem:[#allocation14_spill] sm:$0xff] }
 0x32c   : >> { %v1314_v9 = vsel %vm1303_vm12, 0.0, %v1296_v29  ;;  %v1313_v14 = vsel %vm1303_vm12, 0.0, %v1292_v50  ;;  %v1238_v12 = vsel %vm1235_vm11, %v3753_v23, %v1234_v52  ;;  %v1198_v5 = vmul.f32 %v4490_v45, %v1170_v21 }
 0x32d   : >> { %v1331_v4 = vmul.f32 %v3459_v63, %v1314_v9  ;;  %2123 = vperm.xlu0 %2608, %v3716_v15   ;;  %1874 = vrot.lane.b32.xlu1 %v3136_v47, %s2686_s10  ;;  %v1214_v11 = vmul.f32 %v4486_v0, %v1196_v8  ;;  %v1262_v41 = vmul.f32 %v4493_v62, %v1236_v10  ;;  %v2689_v23 = vmov 24  }
 0x32e   : >> { %v1289_v26 = vadd.f32 %v1283_v43, %v1221_v36  ;;  %v1329_v28 = vmul.f32 %v3459_v63, %v1313_v14  ;;  %v1152_v0 = vadd.f32 %v1146_v59, %v1084_v7  ;;  %v1282_v40 = vmul.f32 %v4488_v44, %v1264_v20  ;;  %v4496_v36 = vld [vmem:[#allocation16_spill] sm:$0xff] }
 0x32f   : >> { %v1349_v34 = vmul.f32 %v4492_v56, %v1331_v4  ;;  %v1300_v24 = vpop.permute.xlu0 %1299  ;;  %v1294_v2 = vpop.permute.xlu1 %1293  ;;  %v1266_v52 = vmul.f32 %v4493_v62, %v1238_v12  ;;  %v1150_v18 = vadd.f32 %v1144_v54, %v3779_v60  ;;  %v1279_v4 = vmul.f32 %v4495_v58, %v1261_v13  ;;  %v2476_v60 = vld [vmem:[%s4270_s6 + $0x15] ss:$8 sm:$0x3] }
 0x330   : >> { %v1315_v53 = vsel %vm1303_vm12, 0.0, %v1300_v24  ;;  %v1304_v3 = vsel %vm1303_vm12, %v1292_v50, %v1294_v2  ;;  %v1212_v50 = vmul.f32 %v4489_v31, %v1194_v1  ;;  %v1216_v7 = vmul.f32 %v4487_v38, %v1198_v5 }
 0x331   : >> { %v3833_v51 = vadd.f32 %v1349_v34, %v1287_v16  ;;  %v1333_v55 = vmul.f32 %v3459_v63, %v1315_v53  ;;  %1939 = vrot.lane.b32.xlu0 %v3130_v39, %s2688_s12  ;;  %1941 = vrot.lane.b32.xlu1 %v3095_v22, %s2688_s12  ;;  %v1330_v9 = vmul.f32 %v3479_v17, %v1304_v3  ;;  %vm1543_vm2 = vcmask 457728  }
 0x332   : >> { %2610 = vset.pattern.permute.xlu0 %v2689_v23  ;;  %v1220_v63 = vadd.f32 %v1214_v11, %v1152_v0  ;;  %v1280_v44 = vmul.f32 %v4495_v58, %v1262_v41  ;;  %v1217_v54 = vadd.f32 %v1211_v32, %v3787_v48  ;;  %v1218_v1 = vadd.f32 %v1212_v50, %v1150_v18  ;;  %v4497_v48 = vld [vmem:[#allocation67_spill] sm:$0xff] }
 0x333   : >> { %v1351_v42 = vmul.f32 %v4494_v57, %v1333_v55  ;;  %v1384_v33 = vpop.permute.xlu0 %1383  ;;  %v1298_v61 = vpop.permute.xlu1 %1297  ;;  %v1347_v8 = vmul.f32 %v4496_v36, %v1329_v28  ;;  %v1284_v38 = vmul.f32 %v4491_v25, %v1266_v52  ;;  %v1348_v10 = vmul.f32 %v4496_v36, %v1330_v9  ;;  %v4498_v55 = vld [vmem:[#allocation18_spill] sm:$0xff]  ;;  %v4500_v9 = vld [vmem:[#allocation20_spill] sm:$0xff] }
 0x334   : >> { %v1305_v31 = vsel %vm1303_vm12, %v1296_v29, %v1298_v61  ;;  %v1154_v29 = vadd.f32 %v1148_v27, %v3789_v46  ;;  %v1288_v16 = vadd.f32 %v1282_v40, %v1220_v63  ;;  %v1285_v13 = vadd.f32 %v1279_v4, %v1217_v54  ;;  %v4501_v54 = vld [vmem:[#allocation35_spill] sm:$0xff] }
 0x335   : >> { %v3852_v45 = vadd.f32 %v1351_v42, %v1289_v26  ;;  %2006 = vrot.lane.b32.xlu0 %v3121_v6, %s2690_s21  ;;  %v1332_v59 = vmul.f32 %v3479_v17, %v1305_v31  ;;  %2119 = vperm.xlu1 %2607, %v3743_v19   ;;  %v1415_v46 = vrot.slane %v2476_v60, %v4497_v48  ;;  %v4499_v42 = vld [vmem:[#allocation34_spill] sm:$0xff]  ;;  %vm1533_vm3 = vcmask 949248  }
 0x336   : >> { %v1419_v32 = vrot.slane %v2476_v60, %v3296_v30  ;;  %v1222_v27 = vadd.f32 %v1216_v7, %v1154_v29  ;;  %v1286_v20 = vadd.f32 %v1280_v44, %v1218_v1  ;;  %v1372_v11 = vmul.f32 %v4498_v55, %v3121_v6 }
 0x337   : >> { %v1388_v21 = vpop.permute.xlu0 %1387  ;;  %v1350_v43 = vmul.f32 %v4492_v56, %v1332_v59  ;;  %v1302_v34 = vpop.permute.xlu1 %1301  ;;  %v1353_v56 = vadd.f32 %v1347_v8, %v1285_v13  ;;  %v1374_v0 = vmul.f32 %v4499_v42, %v3095_v22  ;;  %v1375_v29 = vmul.f32 %v4501_v54, %v3136_v47 }
 0x338   : >> { %v1306_v62 = vsel %vm1303_vm12, %v1300_v24, %v1302_v34  ;;  %v1290_v53 = vadd.f32 %v1284_v38, %v1222_v27  ;;  %v1354_v12 = vadd.f32 %v1348_v10, %v1286_v20  ;;  %v1376_v1 = vmul.f32 %v4501_v54, %v3124_v37  ;;  %v4507_v54 = vld [vmem:[#allocation40_spill] sm:$0xff] }
 0x339   : >> { %2014 = vrot.lane.b32.xlu0 %v3124_v37, %s2690_s21  ;;  %v1356_v14 = vadd.f32 %v1350_v43, %v1288_v16  ;;  %v1334_v25 = vmul.f32 %v3479_v17, %v1306_v62  ;;  %2127 = vperm.xlu1 %2607, %v3776_v49   ;;  %v1371_v17 = vmul.f32 %v4498_v55, %v3114_v35  ;;  %v4502_v8 = vmov 0   ;;  %v4503_v16 = vld [vmem:[#allocation36_spill] sm:$0xff] }
 0x33a   : >> { %v1378_v52 = vadd.f32 %v1372_v11, %v1354_v12  ;;  %v1381_v12 = vadd.f32 %v1375_v29, %v3852_v45  ;;  %vm1612_vm4 = vcmask 449536   ;;  %vm1602_vm5 = vcmask 941056  }
 0x33b   : >> { %v1392_v2 = vpop.permute.xlu0 %1391  ;;  %v1352_v24 = vmul.f32 %v4494_v57, %v1334_v25  ;;  %v1386_v3 = vpop.permute.xlu1 %1385  ;;  %v2477_v57 = vld [vmem:[%s4270_s6 + $0x16] ss:$8 sm:$0x3]  ;;  %v1377_v40 = vadd.f32 %v1371_v17, %v1353_v56  ;;  %vm1681_vm6 = vcmask 441344   ;;  %vm1671_vm7 = vcmask 932864  }
 0x33c   : >> { %v1396_v5 = vsel %vm1395_vm13, %v1384_v33, %v1386_v3  ;;  %v1406_v41 = vsel %vm1405_vm14, %v1386_v3, 0.0  ;;  %v1373_v33 = vmul.f32 %v4499_v42, %v3130_v39  ;;  %v1488_v63 = vrot.slane %v2477_v57, %v3296_v30 }
 0x33d   : >> { %2192 = vperm.xlu0 %2610, %v3716_v15   ;;  %v1358_v50 = vadd.f32 %v1352_v24, %v1290_v53  ;;  %v1422_v26 = vmul.f32 %v1415_v46, %v1396_v5  ;;  %v1423_v28 = vmul.f32 %v1419_v32, %v1406_v41  ;;  %1935 = vrot.lane.b32.xlu1 %v3114_v35, %s2688_s12  ;;  %v4504_v24 = vld [vmem:[#allocation22_spill] sm:$0xff]  ;;  %v4505_v5 = vld [vmem:[#allocation37_spill] sm:$0xff]  ;;  %vm1750_vm8 = vcmask 433152  }
 0x33e   : >> { %2609 = vset.pattern.permute.xlu1 %v2689_v23  ;;  %v1379_v60 = vadd.f32 %v1373_v33, %v3833_v51  ;;  %v2478_v51 = vld [vmem:[%s4270_s6 + $0x17] ss:$8 sm:$0x3]  ;;  %v1484_v20 = vrot.slane %v2477_v57, %v4497_v48  ;;  %vm1740_vm9 = vcmask 924672   ;;  %vm1819_vm10 = vcmask 424960  }
 0x33f   : >> { %v1453_v15 = vpop.permute.xlu0 %1452  ;;  %v1440_v61 = vmul.f32 %v4500_v9, %v1422_v26  ;;  %v1441_v18 = vmul.f32 %v4500_v9, %v1423_v28  ;;  %v1390_v58 = vpop.permute.xlu1 %1389  ;;  %v1557_v55 = vrot.slane %v2478_v51, %v3296_v30  ;;  %v1382_v11 = vadd.f32 %v1376_v1, %v1358_v50  ;;  %v4506_v9 = vld [vmem:[#allocation38_spill] sm:$0xff] }
 0x340   : >> { %v1397_v4 = vsel %vm1395_vm13, %v1388_v21, %v1390_v58  ;;  %v1407_v31 = vsel %vm1405_vm14, %v1390_v58, 0.0  ;;  %v1380_v21 = vadd.f32 %v1374_v0, %v1356_v14  ;;  %vm1809_vm11 = vcmask 916480  }
 0x341   : >> { %2008 = vrot.lane.b32.xlu0 %v3130_v39, %s2690_s21  ;;  %v1446_v7 = vadd.f32 %v1440_v61, %v1377_v40  ;;  %v1447_v44 = vadd.f32 %v1441_v18, %v1378_v52  ;;  %v1424_v23 = vmul.f32 %v1415_v46, %v1397_v4  ;;  %v1425_v59 = vmul.f32 %v1419_v32, %v1407_v31 }
 0x342   : >> { %1943 = vrot.lane.b32.xlu1 %v3136_v47, %s2688_s12  ;;  %2612 = vset.pattern.permute.xlu0 %v4502_v8  ;;  %vm1888_vm12 = vcmask 343040  }
 0x343   : >> { %v1459_v36 = vpop.permute.xlu0 %1458  ;;  %v1442_v38 = vmul.f32 %v4503_v16, %v1424_v23  ;;  %v1443_v10 = vmul.f32 %v4503_v16, %v1425_v59  ;;  %v1394_v43 = vpop.permute.xlu1 %1393 }
 0x344   : >> { %v1476_v34 = vsel %vm1474_vm15, %v1459_v36, 0.0  ;;  %v1398_v13 = vsel %vm1395_vm13, %v1392_v2, %v1394_v43  ;;  %v1408_v62 = vsel %vm1405_vm14, %v1394_v43, 0.0  ;;  %vm1878_vm13 = vcmask 834560  }
 0x345   : >> { %v1494_v27 = vmul.f32 %v1488_v63, %v1476_v34  ;;  %2075 = vrot.lane.b32.xlu0 %v3121_v6, %s2691_s26  ;;  %v1448_v14 = vadd.f32 %v1442_v38, %v1379_v60  ;;  %v1449_v25 = vadd.f32 %v1443_v10, %v1380_v21  ;;  %v1426_v56 = vmul.f32 %v1415_v46, %v1398_v13  ;;  %v4509_v13 = vld [vmem:[#allocation41_spill] sm:$0xff] }
 0x346   : >> { %v1427_v53 = vmul.f32 %v1419_v32, %v1408_v62  ;;  %2010 = vrot.lane.b32.xlu1 %v3095_v22, %s2690_s21  ;;  %vm1957_vm14 = vcmask 334848  }
 0x347   : >> { %v1512_v2 = vmul.f32 %v4504_v24, %v1494_v27  ;;  %v1457_v3 = vpop.permute.xlu0 %1456  ;;  %v1444_v41 = vmul.f32 %v4505_v5, %v1426_v56  ;;  %v1455_v26 = vpop.permute.xlu1 %1454 }
 0x348   : >> { %v1445_v17 = vmul.f32 %v4505_v5, %v1427_v53  ;;  %v1466_v46 = vsel %vm1464_vm1, %v1457_v3, %v1459_v36  ;;  %v1465_v28 = vsel %vm1464_vm1, %v1453_v15, %v1455_v26  ;;  %v1475_v45 = vsel %vm1474_vm15, %v1455_v26, 0.0  ;;  %v4508_v36 = vld [vmem:[#allocation39_spill] sm:$0xff] }
 0x349   : >> { %v3928_v32 = vadd.f32 %v1512_v2, %v1449_v25  ;;  %v1493_v57 = vmul.f32 %v1484_v20, %v1466_v46  ;;  %2083 = vrot.lane.b32.xlu0 %v3124_v37, %s2691_s26  ;;  %v1450_v42 = vadd.f32 %v1444_v41, %v1381_v12  ;;  %v1491_v50 = vmul.f32 %v1484_v20, %v1465_v28  ;;  %v4510_v2 = vld [vmem:[#allocation24_spill] sm:$0xff]  ;;  %v4511_v28 = vld [vmem:[#allocation26_spill] sm:$0xff] }
 0x34a   : >> { %v1451_v33 = vadd.f32 %v1445_v17, %v1382_v11  ;;  %v1492_v0 = vmul.f32 %v1488_v63, %v1475_v45  ;;  %2188 = vperm.xlu1 %2609, %v3743_v19  }
 0x34b   : >> { %v1511_v40 = vmul.f32 %v4504_v24, %v1493_v57  ;;  %v1524_v52 = vpop.permute.xlu0 %1523  ;;  %v1509_v61 = vmul.f32 %v4506_v9, %v1491_v50  ;;  %v1463_v15 = vpop.permute.xlu1 %1462 }
 0x34c   : >> { %v1510_v18 = vmul.f32 %v4506_v9, %v1492_v0  ;;  %v1544_v58 = vsel %vm1543_vm2, %v1524_v52, 0.0  ;;  %v1477_v31 = vsel %vm1474_vm15, %v1463_v15, 0.0  ;;  %vm2026_vm15 = vcmask 326656  }
 0x34d   : >> { %v1517_v4 = vadd.f32 %v1511_v40, %v1448_v14  ;;  %v1561_v23 = vmul.f32 %v1557_v55, %v1544_v58  ;;  %2077 = vrot.lane.b32.xlu0 %v3130_v39, %s2691_s26  ;;  %v1515_v59 = vadd.f32 %v1509_v61, %v1446_v7  ;;  %v1496_v19 = vmul.f32 %v1488_v63, %v1477_v31  ;;  %v2480_v61 = vld [vmem:[%s4270_s6 + $0x21] ss:$8 sm:$0x3] }
 0x34e   : >> { %v1516_v60 = vadd.f32 %v1510_v18, %v1447_v44  ;;  %2196 = vperm.xlu1 %2609, %v3776_v49   ;;  %v1553_v49 = vrot.slane %v2478_v51, %v4497_v48  ;;  %v2479_v44 = vld [vmem:[%s4270_s6 + $0x20] ss:$8 sm:$0x3] }
 0x34f   : >> { %v1579_v29 = vmul.f32 %v4507_v54, %v1561_v23  ;;  %v1532_v1 = vpop.permute.xlu0 %1531  ;;  %v1514_v21 = vmul.f32 %v4508_v36, %v1496_v19  ;;  %v1461_v16 = vpop.permute.xlu1 %1460  ;;  %v1626_v51 = vrot.slane %v2479_v44, %v3296_v30  ;;  %v4512_v18 = vld [vmem:[#allocation43_spill] sm:$0xff]  ;;  %v1695_v19 = vrot.slane %v2480_v61, %v3296_v30 }
 0x350   : >> { %v1546_v38 = vsel %vm1543_vm2, %v1532_v1, 0.0  ;;  %v1467_v43 = vsel %vm1464_vm1, %v1461_v16, %v1463_v15  ;;  %vm1947_vm1 = vcmask 826368  }
 0x351   : >> { %v1585_v10 = vadd.f32 %v1579_v29, %v1516_v60  ;;  %v1565_v34 = vmul.f32 %v1557_v55, %v1546_v38  ;;  %2144 = vrot.lane.b32.xlu0 %v3121_v6, %s2692_s18  ;;  %v1520_v7 = vadd.f32 %v1514_v21, %v1451_v33  ;;  %v1495_v63 = vmul.f32 %v1484_v20, %v1467_v43  ;;  %v4513_v21 = vld [vmem:[#allocation42_spill] sm:$0xff] }
 0x352   : >> { %2004 = vrot.lane.b32.xlu1 %v3114_v35, %s2690_s21 }
 0x353   : >> { %v1583_v62 = vmul.f32 %v4509_v13, %v1565_v34  ;;  %v1526_v27 = vpop.permute.xlu0 %1525  ;;  %2611 = vset.pattern.permute.xlu1 %v4502_v8  ;;  %v1513_v14 = vmul.f32 %v4508_v36, %v1495_v63  ;;  %v1528_v6 = vpop.permute.xlu1 %1527 }
 0x354   : >> { %v1545_v25 = vsel %vm1543_vm2, %v1528_v6, 0.0  ;;  %v1535_v56 = vsel %vm1533_vm3, %v1526_v27, %v1528_v6  ;;  %vm2016_vm2 = vcmask 818176  }
 0x355   : >> { %v1589_v20 = vadd.f32 %v1583_v62, %v1520_v7  ;;  %2152 = vrot.lane.b32.xlu0 %v3124_v37, %s2692_s18  ;;  %v1519_v53 = vadd.f32 %v1513_v14, %v1450_v42  ;;  %v1563_v12 = vmul.f32 %v1557_v55, %v1545_v25  ;;  %v1562_v24 = vmul.f32 %v1553_v49, %v1535_v56 }
 0x356   : >> { %2012 = vrot.lane.b32.xlu1 %v3136_v47, %s2690_s21 }
 0x357   : >> { %v1593_v8 = vpop.permute.xlu0 %1592  ;;  %v1581_v3 = vmul.f32 %v4510_v2, %v1563_v12  ;;  %v1580_v11 = vmul.f32 %v4510_v2, %v1562_v24  ;;  %v1522_v5 = vpop.permute.xlu1 %1521  ;;  %v2481_v24 = vld [vmem:[%s4270_s6 + $0x22] ss:$8 sm:$0x3] }
 0x358   : >> { %v1613_v41 = vsel %vm1612_vm4, %v1593_v8, 0.0  ;;  %v1534_v17 = vsel %vm1533_vm3, %v1522_v5, %v1524_v52 }
 0x359   : >> { %v1630_v26 = vmul.f32 %v1626_v51, %v1613_v41  ;;  %2146 = vrot.lane.b32.xlu0 %v3130_v39, %s2692_s18  ;;  %v1587_v37 = vadd.f32 %v1581_v3, %v3928_v32  ;;  %v1586_v55 = vadd.f32 %v1580_v11, %v1517_v4  ;;  %v1560_v46 = vmul.f32 %v1553_v49, %v1534_v17 }
 0x35a   : >> { %2079 = vrot.lane.b32.xlu1 %v3095_v22, %s2691_s26  ;;  %v1622_v32 = vrot.slane %v2479_v44, %v4497_v48 }
 0x35b   : >> { %v1648_v45 = vmul.f32 %v4511_v28, %v1630_v26  ;;  %v1601_v57 = vpop.permute.xlu0 %1600  ;;  %v1578_v42 = vmul.f32 %v4507_v54, %v1560_v46  ;;  %v1530_v33 = vpop.permute.xlu1 %1529 }
 0x35c   : >> { %v1615_v50 = vsel %vm1612_vm4, %v1601_v57, 0.0  ;;  %v1536_v40 = vsel %vm1533_vm3, %v1530_v33, %v1532_v1  ;;  %vm2095_vm3 = vcmask 318464  }
 0x35d   : >> { %v1654_v0 = vadd.f32 %v1648_v45, %v1585_v10  ;;  %v1634_v52 = vmul.f32 %v1626_v51, %v1615_v50  ;;  %v1584_v39 = vadd.f32 %v1578_v42, %v1515_v59  ;;  %v1564_v9 = vmul.f32 %v1553_v49, %v1536_v40  ;;  %v4516_v45 = vld [vmem:[#allocation28_spill] sm:$0xff] }
 0x35e   : >> { %2073 = vrot.lane.b32.xlu1 %v3114_v35, %s2691_s26 }
 0x35f   : >> { %v1652_v15 = vmul.f32 %v4512_v18, %v1634_v52  ;;  %v1595_v58 = vpop.permute.xlu0 %1594  ;;  %v1582_v4 = vmul.f32 %v4509_v13, %v1564_v9  ;;  %v1597_v31 = vpop.permute.xlu1 %1596  ;;  %v4514_v13 = vld [vmem:[#allocation44_spill] sm:$0xff] }
 0x360   : >> { %v1614_v59 = vsel %vm1612_vm4, %v1597_v31, 0.0  ;;  %v1604_v60 = vsel %vm1602_vm5, %v1595_v58, %v1597_v31  ;;  %vm2085_vm4 = vcmask 809984  }
 0x361   : >> { %v1658_v23 = vadd.f32 %v1652_v15, %v1589_v20  ;;  %v1588_v54 = vadd.f32 %v1582_v4, %v1519_v53  ;;  %v1632_v29 = vmul.f32 %v1626_v51, %v1614_v59  ;;  %v1631_v1 = vmul.f32 %v1622_v32, %v1604_v60 }
 0x362   : >> { %2081 = vrot.lane.b32.xlu1 %v3136_v47, %s2691_s26 }
 0x363   : >> { %v1662_v36 = vpop.permute.xlu0 %1661  ;;  %v1650_v16 = vmul.f32 %v4513_v21, %v1632_v29  ;;  %v1649_v38 = vmul.f32 %v4513_v21, %v1631_v1  ;;  %v1591_v10 = vpop.permute.xlu1 %1590  ;;  %v4518_v29 = vld [vmem:[#allocation47_spill] sm:$0xff] }
 0x364   : >> { %v1682_v43 = vsel %vm1681_vm6, %v1662_v36, 0.0  ;;  %v1603_v34 = vsel %vm1602_vm5, %v1591_v10, %v1593_v8  ;;  %v4515_v8 = vld [vmem:[#allocation45_spill] sm:$0xff] }
 0x365   : >> { %v1699_v7 = vmul.f32 %v1695_v19, %v1682_v43  ;;  %v1656_v63 = vadd.f32 %v1650_v16, %v1587_v37  ;;  %v1655_v49 = vadd.f32 %v1649_v38, %v1586_v55  ;;  %v1629_v44 = vmul.f32 %v1622_v32, %v1603_v34 }
 0x366   : >> { %2148 = vrot.lane.b32.xlu1 %v3095_v22, %s2692_s18  ;;  %v1691_v22 = vrot.slane %v2480_v61, %v4497_v48 }
 0x367   : >> { %v1717_v62 = vmul.f32 %v4514_v13, %v1699_v7  ;;  %v1670_v27 = vpop.permute.xlu0 %1669  ;;  %v1647_v14 = vmul.f32 %v4511_v28, %v1629_v44  ;;  %v1599_v6 = vpop.permute.xlu1 %1598 }
 0x368   : >> { %v1684_v20 = vsel %vm1681_vm6, %v1670_v27, 0.0  ;;  %v1605_v56 = vsel %vm1602_vm5, %v1599_v6, %v1601_v57  ;;  %vm2164_vm5 = vcmask 310272  }
 0x369   : >> { %v1723_v25 = vadd.f32 %v1717_v62, %v1654_v0  ;;  %v1703_v51 = vmul.f32 %v1695_v19, %v1684_v20  ;;  %v1653_v53 = vadd.f32 %v1647_v14, %v1584_v39  ;;  %v1633_v12 = vmul.f32 %v1622_v32, %v1605_v56  ;;  %v4517_v32 = vld [vmem:[#allocation46_spill] sm:$0xff] }
 0x36a   : >> { %2142 = vrot.lane.b32.xlu1 %v3114_v35, %s2692_s18  ;;  %v1764_v35 = vrot.slane %v2481_v24, %v3296_v30 }
 0x36b   : >> { %v1721_v2 = vmul.f32 %v4515_v8, %v1703_v51  ;;  %v1664_v3 = vpop.permute.xlu0 %1663  ;;  %v1651_v11 = vmul.f32 %v4512_v18, %v1633_v12  ;;  %v1666_v5 = vpop.permute.xlu1 %1665  ;;  %v4520_v12 = vld [vmem:[#allocation48_spill] sm:$0xff] }
 0x36c   : >> { %v1683_v17 = vsel %vm1681_vm6, %v1666_v5, 0.0  ;;  %v1673_v26 = vsel %vm1671_vm7, %v1664_v3, %v1666_v5  ;;  %vm2154_vm6 = vcmask 801792  }
 0x36d   : >> { %v1727_v41 = vadd.f32 %v1721_v2, %v1658_v23  ;;  %v1657_v37 = vadd.f32 %v1651_v11, %v1588_v54  ;;  %v1701_v55 = vmul.f32 %v1695_v19, %v1683_v17  ;;  %v1700_v46 = vmul.f32 %v1691_v22, %v1673_v26  ;;  %v2482_v54 = vld [vmem:[%s4270_s6 + $0x23] ss:$8 sm:$0x3] }
 0x36e   : >> { %2150 = vrot.lane.b32.xlu1 %v3136_v47, %s2692_s18  ;;  %v1760_v19 = vrot.slane %v2481_v24, %v4497_v48  ;;  %v1833_v34 = vrot.slane %v2482_v54, %v3296_v30  ;;  %s431_s18 = scalar_lea.vmem %s388_s23, %s2780_s9 }
 0x36f   : >> { %v1731_v28 = vpop.permute.xlu0 %1730  ;;  %v1719_v57 = vmul.f32 %v4516_v45, %v1701_v55  ;;  %v1718_v42 = vmul.f32 %v4516_v45, %v1700_v46  ;;  %v1660_v33 = vpop.permute.xlu1 %1659 }
 0x370   : >> { %v1751_v50 = vsel %vm1750_vm8, %v1731_v28, 0.0  ;;  %v1672_v0 = vsel %vm1671_vm7, %v1660_v33, %v1662_v36 }
 0x371   : >> { %v1768_v40 = vmul.f32 %v1764_v35, %v1751_v50  ;;  %v1725_v52 = vadd.f32 %v1719_v57, %v1656_v63  ;;  %v1724_v39 = vadd.f32 %v1718_v42, %v1655_v49  ;;  %v1698_v9 = vmul.f32 %v1691_v22, %v1672_v0 }
 0x373   : >> { %v1786_v61 = vmul.f32 %v4517_v32, %v1768_v40  ;;  %v1739_v18 = vpop.permute.xlu0 %1738  ;;  %v1716_v15 = vmul.f32 %v4514_v13, %v1698_v9  ;;  %v1668_v47 = vpop.permute.xlu1 %1667  ;;  %v4519_v13 = vld [vmem:[#allocation54_spill] sm:$0xff] }
 0x374   : >> { %v1753_v58 = vsel %vm1750_vm8, %v1739_v18, 0.0  ;;  %v1674_v31 = vsel %vm1671_vm7, %v1668_v47, %v1670_v27 }
 0x375   : >> { %v1792_v4 = vadd.f32 %v1786_v61, %v1723_v25  ;;  %v1772_v23 = vmul.f32 %v1764_v35, %v1753_v58  ;;  %v1722_v59 = vadd.f32 %v1716_v15, %v1653_v53  ;;  %v1702_v60 = vmul.f32 %v1691_v22, %v1674_v31  ;;  %v2483_v31 = vld [vmem:[%s4270_s6 + $0x24] ss:$8 sm:$0x3] }
 0x377   : >> { %v1790_v1 = vmul.f32 %v4518_v29, %v1772_v23  ;;  %v1733_v36 = vpop.permute.xlu0 %1732  ;;  %v1720_v21 = vmul.f32 %v4515_v8, %v1702_v60  ;;  %v1735_v16 = vpop.permute.xlu1 %1734 }
 0x378   : >> { %v1752_v10 = vsel %vm1750_vm8, %v1735_v16, 0.0  ;;  %v1742_v43 = vsel %vm1740_vm9, %v1733_v36, %v1735_v16 }
 0x379   : >> { %v1796_v38 = vadd.f32 %v1790_v1, %v1727_v41  ;;  %v1726_v7 = vadd.f32 %v1720_v21, %v1657_v37  ;;  %v1770_v63 = vmul.f32 %v1764_v35, %v1752_v10  ;;  %v1769_v49 = vmul.f32 %v1760_v19, %v1742_v43  ;;  %v4521_v37 = vld [vmem:[#allocation49_spill] sm:$0xff] }
 0x37a   : >> { %v1829_v35 = vrot.slane %v2482_v54, %v4497_v48 }
 0x37b   : >> { %v1800_v44 = vpop.permute.xlu0 %1799  ;;  %v1788_v62 = vmul.f32 %v4519_v13, %v1770_v63  ;;  %v1787_v27 = vmul.f32 %v4519_v13, %v1769_v49  ;;  %v1729_v14 = vpop.permute.xlu1 %1728  ;;  %v4073_v63 = vrot.slane %v2483_v31, %v4497_v48 }
 0x37c   : >> { %v1820_v6 = vsel %vm1819_vm10, %v1800_v44, 0.0  ;;  %v1741_v20 = vsel %vm1740_vm9, %v1729_v14, %v1731_v28 }
 0x37d   : >> { %v1837_v25 = vmul.f32 %v1833_v34, %v1820_v6  ;;  %v1794_v56 = vadd.f32 %v1788_v62, %v1725_v52  ;;  %v1793_v51 = vadd.f32 %v1787_v27, %v1724_v39  ;;  %v1767_v53 = vmul.f32 %v1760_v19, %v1741_v20  ;;  %v4522_v52 = vld [vmem:[#allocation55_spill] sm:$0xff] }
 0x37f   : >> { %v1855_v22 = vmul.f32 %v4520_v12, %v1837_v25  ;;  %v1808_v24 = vpop.permute.xlu0 %1807  ;;  %v1785_v8 = vmul.f32 %v4517_v32, %v1767_v53  ;;  %v1737_v2 = vpop.permute.xlu1 %1736 }
 0x380   : >> { %v1822_v3 = vsel %vm1819_vm10, %v1808_v24, 0.0  ;;  %v1743_v5 = vsel %vm1740_vm9, %v1737_v2, %v1739_v18 }
 0x381   : >> { %v4038_v11 = vadd.f32 %v1855_v22, %v1792_v4  ;;  %v1841_v41 = vmul.f32 %v1833_v34, %v1822_v3  ;;  %v1791_v17 = vadd.f32 %v1785_v8, %v1722_v59  ;;  %v1771_v26 = vmul.f32 %v1760_v19, %v1743_v5  ;;  %v2485_v5 = vld [vmem:[%s4270_s6 + $0x26] ss:$8 sm:$0x3] }
 0x382   : >> { %v1902_v19 = vrot.slane %v2483_v31, %v3296_v30 }
 0x383   : >> { %v1859_v55 = vmul.f32 %v4521_v37, %v1841_v41  ;;  %v1802_v46 = vpop.permute.xlu0 %1801  ;;  %v1789_v28 = vmul.f32 %v4518_v29, %v1771_v26  ;;  %v1804_v45 = vpop.permute.xlu1 %1803 }
 0x384   : >> { %v1821_v42 = vsel %vm1819_vm10, %v1804_v45, 0.0  ;;  %v1811_v33 = vsel %vm1809_vm11, %v1802_v46, %v1804_v45  ;;  %v4525_v45 = vld [vmem:[#allocation52_spill] sm:$0xff] }
 0x385   : >> { %v4044_v57 = vadd.f32 %v1859_v55, %v1796_v38  ;;  %v1795_v50 = vadd.f32 %v1789_v28, %v1726_v7  ;;  %v1839_v0 = vmul.f32 %v1833_v34, %v1821_v42  ;;  %v1838_v40 = vmul.f32 %v1829_v35, %v1811_v33  ;;  %v4523_v38 = vld [vmem:[#allocation56_spill] sm:$0xff] }
 0x386   : >> { %v4108_v28 = vrot.slane %v2485_v5, %v3296_v30 }
 0x387   : >> { %v1857_v39 = vmul.f32 %v4522_v52, %v1839_v0  ;;  %v1856_v9 = vmul.f32 %v4522_v52, %v1838_v40  ;;  %v1798_v32 = vpop.permute.xlu1 %1797  ;;  %v4061_v36 = vpop.permute.xlu0 %1868 }
 0x388   : >> { %v1810_v61 = vsel %vm1809_vm11, %v1798_v32, %v1800_v44  ;;  %v1889_v53 = vsel %vm1888_vm12, %v4061_v36, 0.0 }
 0x389   : >> { %v1863_v18 = vadd.f32 %v1857_v39, %v1794_v56  ;;  %v1862_v15 = vadd.f32 %v1856_v9, %v1793_v51  ;;  %v1836_v47 = vmul.f32 %v1829_v35, %v1810_v61  ;;  %v2484_v56 = vld [vmem:[%s4270_s6 + $0x25] ss:$8 sm:$0x3]  ;;  %v1906_v2 = vmul.f32 %v1902_v19, %v1889_v53 }
 0x38a   : >> { %v4526_v39 = vld [vmem:[#allocation51_spill] sm:$0xff] }
 0x38b   : >> { %v1854_v58 = vmul.f32 %v4520_v12, %v1836_v47  ;;  %v1806_v4 = vpop.permute.xlu1 %1805  ;;  %v4068_v34 = vpop.permute.xlu0 %1876  ;;  %v4090_v12 = vrot.slane %v2484_v56, %v3296_v30 }
 0x38c   : >> { %v1812_v23 = vsel %vm1809_vm11, %v1806_v4, %v1808_v24  ;;  %v1891_v3 = vsel %vm1888_vm12, %v4068_v34, 0.0 }
 0x38d   : >> { %v4056_v59 = vadd.f32 %v1854_v58, %v1791_v17  ;;  %v1840_v60 = vmul.f32 %v1829_v35, %v1812_v23  ;;  %v1910_v46 = vmul.f32 %v1902_v19, %v1891_v3 }
 0x38f   : >> { %v1858_v54 = vmul.f32 %v4521_v37, %v1840_v60  ;;  %v1873_v29 = vpop.permute.xlu1 %1872  ;;  %v4524_v37 = vld [vmem:[#allocation50_spill] sm:$0xff]  ;;  %v1928_v9 = vmul.f32 %v4526_v39, %v1910_v46 }
 0x390   : >> { %v1890_v1 = vsel %vm1888_vm12, %v1873_v29, 0.0  ;;  %v1924_v55 = vmul.f32 %v4524_v37, %v1906_v2 }
 0x391   : >> { %v4063_v21 = vadd.f32 %v1858_v54, %v1795_v50  ;;  %v1908_v16 = vmul.f32 %v1902_v19, %v1890_v1  ;;  %v1934_v23 = vadd.f32 %v1928_v9, %v4044_v57 }
 0x392   : >> { %v1930_v52 = vadd.f32 %v1924_v55, %v4038_v11 }
 0x393   : >> { %v1926_v10 = vmul.f32 %v4523_v38, %v1908_v16 }
 0x395   : >> { %v4066_v43 = vadd.f32 %v1926_v10, %v1863_v18  ;;  %v4527_v18 = vld [vmem:[#allocation53_spill] sm:$0xff] }
 0x39c   : >> { %v4070_v7 = vpop.permute.xlu0 %2054 }
 0x3a0   : >> { %v1871_v49 = vpop.permute.xlu0 %1870  ;;  %v4075_v44 = vpop.permute.xlu1 %2050 }
 0x3a1   : >> { %v1880_v13 = vsel %vm1878_vm13, %v1871_v49, %v1873_v29 }
 0x3a2   : >> { %v1907_v62 = vmul.f32 %v4073_v63, %v1880_v13 }
 0x3a4   : >> { %v1925_v27 = vmul.f32 %v4523_v38, %v1907_v62  ;;  %v1938_v14 = vpop.permute.xlu0 %1937  ;;  %v4080_v6 = vpop.permute.xlu1 %2058 }
 0x3a5   : >> { %v1958_v24 = vsel %vm1957_vm14, %v1938_v14, 0.0 }
 0x3a6   : >> { %v4082_v20 = vadd.f32 %v1925_v27, %v1862_v15  ;;  %v1975_v41 = vmul.f32 %v4090_v12, %v1958_v24  ;;  %v1967_v24 = vrot.slane %v2484_v56, %v4497_v48  ;;  %v2036_v56 = vrot.slane %v2485_v5, %v4497_v48 }
 0x3a8   : >> { %v1946_v25 = vpop.permute.xlu0 %1945  ;;  %v1867_v51 = vpop.permute.xlu1 %1866  ;;  %v1993_v42 = vmul.f32 %v4525_v45, %v1975_v41 }
 0x3a9   : >> { %v1960_v26 = vsel %vm1957_vm14, %v1946_v25, 0.0  ;;  %v1879_v57 = vsel %vm1878_vm13, %v1867_v51, %v4061_v36 }
 0x3aa   : >> { %v1979_v33 = vmul.f32 %v4090_v12, %v1960_v26  ;;  %v1999_v61 = vadd.f32 %v1993_v42, %v1930_v52  ;;  %v1905_v53 = vmul.f32 %v4073_v63, %v1879_v57 }
 0x3ac   : >> { %v4092_v22 = vpop.permute.xlu0 %2123  ;;  %v1875_v8 = vpop.permute.xlu1 %1874  ;;  %v1997_v15 = vmul.f32 %v4527_v18, %v1979_v33  ;;  %v1923_v36 = vmul.f32 %v4524_v37, %v1905_v53 }
 0x3ad   : >> { %v1881_v2 = vsel %vm1878_vm13, %v1875_v8, %v4068_v34 }
 0x3ae   : >> { %v2003_v19 = vadd.f32 %v1997_v15, %v1934_v23  ;;  %v1909_v51 = vmul.f32 %v4073_v63, %v1881_v2  ;;  %v1929_v8 = vadd.f32 %v1923_v36, %v4056_v59 }
 0x3b0   : >> { %v4101_v17 = vpop.permute.xlu0 %1939  ;;  %v4104_v35 = vpop.permute.xlu1 %1941  ;;  %v1927_v33 = vmul.f32 %v4526_v39, %v1909_v51 }
 0x3b1   : >> { %v1959_v59 = vsel %vm1957_vm14, %v4104_v35, 0.0 }
 0x3b4   : >> { %v2007_v50 = vpop.permute.xlu0 %2006  ;;  %v4112_v0 = vpop.permute.xlu1 %2119 }
 0x3b5   : >> { %v2027_v40 = vsel %vm2026_vm15, %v2007_v50, 0.0 }
 0x3b6   : >> { %v2044_v32 = vmul.f32 %v4108_v28, %v2027_v40 }
 0x3b8   : >> { %v2062_v47 = vmul.f32 %v4075_v44, %v2044_v32  ;;  %v2015_v58 = vpop.permute.xlu0 %2014  ;;  %v4120_v4 = vpop.permute.xlu1 %2127  ;;  %v1933_v32 = vadd.f32 %v1927_v33, %v4063_v21 }
 0x3b9   : >> { %v2029_v31 = vsel %vm2026_vm15, %v2015_v58, 0.0 }
 0x3ba   : >> { %v4124_v60 = vadd.f32 %v2062_v47, %v1999_v61  ;;  %v2048_v11 = vmul.f32 %v4108_v28, %v2029_v31 }
 0x3bc   : >> { %v2066_v54 = vmul.f32 %v4080_v6, %v2048_v11  ;;  %v4128_v29 = vpop.permute.xlu0 %2192  ;;  %v1936_v1 = vpop.permute.xlu1 %1935 }
 0x3bd   : >> { %v1948_v27 = vsel %vm1947_vm1, %v1936_v1, %v1938_v14 }
 0x3be   : >> { %v4130_v16 = vadd.f32 %v2066_v54, %v2003_v19  ;;  %v1974_v3 = vmul.f32 %v1967_v24, %v1948_v27  ;;  %v2487_v54 = vld [vmem:[%s4270_s6 + $0x30] ss:$8 sm:$0x3] }
 0x3bf   : >> { %v2178_v2 = vrot.slane %v2487_v54, %v3296_v30 }
 0x3c0   : >> { %v1944_v38 = vpop.permute.xlu1 %1943  ;;  %v2009_v10 = vpop.permute.xlu0 %2008  ;;  %v1992_v14 = vmul.f32 %v4525_v45, %v1974_v3 }
 0x3c1   : >> { %v1950_v55 = vsel %vm1947_vm1, %v1944_v38, %v1946_v25 }
 0x3c2   : >> { %v1978_v46 = vmul.f32 %v1967_v24, %v1950_v55  ;;  %v1998_v25 = vadd.f32 %v1992_v14, %v1929_v8 }
 0x3c4   : >> { %v2011_v49 = vpop.permute.xlu1 %2010  ;;  %v4132_v13 = vpop.permute.xlu0 %2075  ;;  %v1996_v37 = vmul.f32 %v4527_v18, %v1978_v46 }
 0x3c5   : >> { %v2018_v47 = vsel %vm2016_vm2, %v2009_v10, %v2011_v49  ;;  %v2028_v23 = vsel %vm2026_vm15, %v2011_v49, 0.0  ;;  %v4528_v49 = vld [vmem:[#allocation57_spill] sm:$0xff] }
 0x3c6   : >> { %v2002_v39 = vadd.f32 %v1996_v37, %v1933_v32  ;;  %v2045_v19 = vmul.f32 %v2036_v56, %v2018_v47  ;;  %v2046_v10 = vmul.f32 %v4108_v28, %v2028_v23 }
 0x3c8   : >> { %v4143_v41 = vpop.permute.xlu0 %2083  ;;  %v2063_v36 = vmul.f32 %v4070_v7, %v2045_v19  ;;  %v2064_v46 = vmul.f32 %v4070_v7, %v2046_v10 }
 0x3c9   : >> { %v4136_v62 = vpop.permute.xlu1 %2188  ;;  %v2098_v28 = vsel %vm2095_vm3, %v4143_v41, 0.0 }
 0x3cc   : >> { %v2078_v40 = vpop.permute.xlu0 %2077 }
 0x3cd   : >> { %v4145_v26 = vpop.permute.xlu1 %2196 }
 0x3d0   : >> { %v4169_v18 = vpop.permute.xlu0 %2144 }
 0x3d1   : >> { %v2005_v42 = vpop.permute.xlu1 %2004  ;;  %v2165_v51 = vsel %vm2164_vm5, %v4169_v18, 0.0 }
 0x3d2   : >> { %v2017_v34 = vsel %vm2016_vm2, %v2005_v42, %v2007_v50  ;;  %v1949_v50 = vsel %vm1947_vm1, %v4101_v17, %v4104_v35  ;;  %v2182_v33 = vmul.f32 %v2178_v2, %v2165_v51 }
 0x3d3   : >> { %v2043_v52 = vmul.f32 %v2036_v56, %v2017_v34  ;;  %v1976_v31 = vmul.f32 %v1967_v24, %v1949_v50  ;;  %v2174_v34 = vrot.slane %v2487_v54, %v4497_v48 }
 0x3d4   : >> { %v2153_v53 = vpop.permute.xlu0 %2152 }
 0x3d5   : >> { %v2061_v63 = vmul.f32 %v4075_v44, %v2043_v52  ;;  %v2013_v9 = vpop.permute.xlu1 %2012  ;;  %v2486_v44 = vld [vmem:[%s4270_s6 + $0x27] ss:$8 sm:$0x3]  ;;  %v1994_v27 = vmul.f32 %v4528_v49, %v1976_v31  ;;  %v2167_v37 = vsel %vm2164_vm5, %v2153_v53, 0.0 }
 0x3d6   : >> { %v2019_v45 = vsel %vm2016_vm2, %v2013_v9, %v2015_v58  ;;  %v1977_v58 = vmul.f32 %v4090_v12, %v1959_v59  ;;  %v2109_v35 = vrot.slane %v2486_v44, %v3296_v30  ;;  %v2105_v11 = vrot.slane %v2486_v44, %v4497_v48 }
 0x3d7   : >> { %v4159_v5 = vadd.f32 %v2061_v63, %v1998_v25  ;;  %v2047_v61 = vmul.f32 %v2036_v56, %v2019_v45  ;;  %v2000_v30 = vadd.f32 %v1994_v27, %v4082_v20  ;;  %v2200_v59 = vmul.f32 %v4136_v62, %v2182_v33 }
 0x3d8   : >> { %v1995_v57 = vmul.f32 %v4528_v49, %v1977_v58  ;;  %v2117_v25 = vmul.f32 %v2109_v35, %v2098_v28  ;;  %v2147_v63 = vpop.permute.xlu0 %2146 }
 0x3d9   : >> { %v2065_v15 = vmul.f32 %v4080_v6, %v2047_v61  ;;  %v2080_v21 = vpop.permute.xlu1 %2079  ;;  %v2096_v6 = vsel %vm2095_vm3, %v4132_v13, 0.0  ;;  %v2069_v52 = vadd.f32 %v2063_v36, %v2000_v30 }
 0x3da   : >> { %v2087_v1 = vsel %vm2085_vm4, %v2078_v40, %v2080_v21  ;;  %v2097_v12 = vsel %vm2095_vm3, %v2080_v21, 0.0  ;;  %v2113_v24 = vmul.f32 %v2109_v35, %v2096_v6  ;;  %v2001_v42 = vadd.f32 %v1995_v57, %v4066_v43 }
 0x3db   : >> { %v4175_v17 = vadd.f32 %v2065_v15, %v2002_v39  ;;  %v2114_v3 = vmul.f32 %v2105_v11, %v2087_v1  ;;  %v2115_v55 = vmul.f32 %v2109_v35, %v2097_v12  ;;  %v2135_v31 = vmul.f32 %v4120_v4, %v2117_v25 }
 0x3dc   : >> { %v2131_v8 = vmul.f32 %v4112_v0, %v2113_v24  ;;  %v2070_v43 = vadd.f32 %v2064_v46, %v2001_v42 }
 0x3dd   : >> { %v2074_v38 = vpop.permute.xlu1 %2073  ;;  %v2132_v40 = vmul.f32 %v4092_v22, %v2114_v3  ;;  %v2133_v7 = vmul.f32 %v4092_v22, %v2115_v55  ;;  %v2186_v22 = vmul.f32 %v2178_v2, %v2167_v37 }
 0x3de   : >> { %v2086_v56 = vsel %vm2085_vm4, %v2074_v38, %v4132_v13  ;;  %v2141_v38 = vadd.f32 %v2135_v31, %v4130_v16  ;;  %v432_v31 = vld [vmem:[%s431_s18] sm:$0xff] }
 0x3df   : >> { %v2112_v13 = vmul.f32 %v2105_v11, %v2086_v56  ;;  %v2138_v50 = vadd.f32 %v2132_v40, %v2069_v52  ;;  %v2139_v39 = vadd.f32 %v2133_v7, %v2070_v43  ;;  %v2204_v1 = vmul.f32 %v4145_v26, %v2186_v22 }
 0x3e1   : >> { %v2082_v14 = vpop.permute.xlu1 %2081  ;;  %v2130_v44 = vmul.f32 %v4112_v0, %v2112_v13  ;;  %v2210_v27 = vadd.f32 %v2204_v1, %v2141_v38 }
 0x3e2   : >> { %v2088_v20 = vsel %vm2085_vm4, %v2082_v14, %v4143_v41  ;;  %v2137_v41 = vadd.f32 %v2131_v8, %v4124_v60 }
 0x3e3   : >> { %v2116_v15 = vmul.f32 %v2105_v11, %v2088_v20  ;;  %v2136_v0 = vadd.f32 %v2130_v44, %v4159_v5  ;;  %v2219_v3 = vsel %vm435_vm0, %v2210_v27, 0.0 }
 0x3e4   : >> { %v2206_v54 = vadd.f32 %v2200_v59, %v2137_v41 }
 0x3e5   : >> { %v2149_v9 = vpop.permute.xlu1 %2148  ;;  %v2134_v11 = vmul.f32 %v4120_v4, %v2116_v15 }
 0x3e6   : >> { %v2156_v48 = vsel %vm2154_vm6, %v2147_v63, %v2149_v9  ;;  %v2166_v45 = vsel %vm2164_vm5, %v2149_v9, 0.0  ;;  %v2211_v24 = vsel %vm435_vm0, %v2206_v54, 0.0 }
 0x3e7   : >> { %v2183_v32 = vmul.f32 %v2174_v34, %v2156_v48  ;;  %v2184_v61 = vmul.f32 %v2178_v2, %v2166_v45  ;;  %v2140_v5 = vadd.f32 %v2134_v11, %v4175_v17 }
 0x3e9   : >> { %v2201_v21 = vmul.f32 %v4128_v29, %v2183_v32  ;;  %v2202_v47 = vmul.f32 %v4128_v29, %v2184_v61  ;;  %v2143_v58 = vpop.permute.xlu1 %2142 }
 0x3ea   : >> { %v2155_v23 = vsel %vm2154_vm6, %v2143_v58, %v4169_v18 }
 0x3eb   : >> { %v2208_v35 = vadd.f32 %v2202_v47, %v2139_v39  ;;  %v2181_v19 = vmul.f32 %v2174_v34, %v2155_v23  ;;  %v2207_v6 = vadd.f32 %v2201_v21, %v2138_v50  ;;  %v429_v39 = vld [vmem:[%s427_s25 + $0x8] sm:$0xff]  ;;  %v428_v47 = vld [vmem:[%s427_s25] sm:$0xff] }
 0x3ec   : >> { %v433_v23 = vld [vmem:[%s431_s18 + $0x8] sm:$0xff] }
 0x3ed   : >> { %v2199_v29 = vmul.f32 %v4136_v62, %v2181_v19  ;;  %v2151_v12 = vpop.permute.xlu1 %2150  ;;  %v2215_v60 = vsel %vm435_vm0, %v2208_v35, 0.0  ;;  %v430_v19 = vld [vmem:[%s427_s25 + $0x10] sm:$0xff] }
 0x3ee   : >> { %v2157_v10 = vsel %vm2154_vm6, %v2151_v12, %v2153_v53  ;;  %v2216_v18 = vadd.f32 %v2215_v60, %v2207_v6 }
 0x3ef   : >> { %v2185_v49 = vmul.f32 %v2174_v34, %v2157_v10  ;;  %v2205_v57 = vadd.f32 %v2199_v29, %v2136_v0 }
 0x3f0   : >> { %2217 = vadd.xlane.f32.xlu1 %v2216_v18 }
 0x3f1   : >> { %v2203_v4 = vmul.f32 %v4145_v26, %v2185_v49  ;;  %v2212_v2 = vadd.f32 %v2211_v24, %v2205_v57 }
 0x3f3   : >> { %2213 = vadd.xlane.f32.xlu0 %v2212_v2  ;;  %v2209_v62 = vadd.f32 %v2203_v4, %v2140_v5 }
 0x3f5   : >> { %v2220_v55 = vadd.f32 %v2219_v3, %v2209_v62 }
 0x3f7   : >> { %2221 = vadd.xlane.f32.xlu0 %v2220_v55 }
 0x47d   : >> { %v2218_v16 = vpop.xlane.xlu1 %2217 }
 0x47e   : >> { %v2224_v53 = vmul.f32 0.0051020407, %v2218_v16 }
 0x480   : >> { %v4228_v36 = vsub.f32 %v2207_v6, %v2224_v53  ;;  %v4230_v51 = vsub.f32 %v2208_v35, %v2224_v53  ;;  %v2214_v14 = vpop.xlane.xlu0 %2213 }
 0x481   : >> { %v2223_v46 = vmul.f32 0.0051020407, %v2214_v14 }
 0x482   : >> { %v2234_v17 = vmul.f32 %v4228_v36, %v4228_v36  ;;  %v2235_v26 = vmul.f32 %v4230_v51, %v4230_v51 }
 0x483   : >> { %v2226_v28 = vsub.f32 %v2205_v57, %v2223_v46  ;;  %v2227_v56 = vsub.f32 %v2206_v54, %v2223_v46  ;;  %v434_v54 = vld [vmem:[%s431_s18 + $0x10] sm:$0xff] }
 0x484   : >> { %v2222_v42 = vpop.xlane.xlu0 %2221  ;;  %v2242_v30 = vsel %vm435_vm0, %v2235_v26, 0.0 }
 0x485   : >> { %v2232_v34 = vmul.f32 %v2226_v28, %v2226_v28  ;;  %v2233_v8 = vmul.f32 %v2227_v56, %v2227_v56  ;;  %v2225_v33 = vmul.f32 0.0051020407, %v2222_v42  ;;  %v2243_v40 = vadd.f32 %v2242_v30, %v2234_v17 }
 0x487   : >> { %v2230_v7 = vsub.f32 %v2209_v62, %v2225_v33  ;;  %v2231_v52 = vsub.f32 %v2210_v27, %v2225_v33  ;;  %2244 = vadd.xlane.f32.xlu1 %v2243_v40  ;;  %v2238_v25 = vsel %vm435_vm0, %v2233_v8, 0.0 }
 0x488   : >> { %v2239_v37 = vadd.f32 %v2238_v25, %v2232_v34 }
 0x489   : >> { %v2236_v63 = vmul.f32 %v2230_v7, %v2230_v7  ;;  %v2237_v13 = vmul.f32 %v2231_v52, %v2231_v52 }
 0x48a   : >> { %2240 = vadd.xlane.f32.xlu0 %v2239_v37 }
 0x48b   : >> { %v2246_v9 = vsel %vm435_vm0, %v2237_v13, 0.0 }
 0x48c   : >> { %v2247_v43 = vadd.f32 %v2246_v9, %v2236_v63 }
 0x48e   : >> { %2248 = vadd.xlane.f32.xlu0 %v2247_v43 }
 0x514   : >> { %v2245_v20 = vpop.xlane.xlu1 %2244 }
 0x515   : >> { %v2251_v48 = vmul.f32 0.0051020407, %v2245_v20 }
 0x517   : >> { %v2254_v45 = vadd.f32 0.001, %v2251_v48  ;;  %v2241_v32 = vpop.xlane.xlu0 %2240 }
 0x518   : >> { %v2250_v61 = vmul.f32 0.0051020407, %v2241_v32 }
 0x519   : >> { %2619 = vrsqrt.f32 %v2254_v45 }
 0x51a   : >> { %v2253_v59 = vadd.f32 0.001, %v2250_v61 }
 0x51b   : >> { %v2249_v22 = vpop.xlane.xlu0 %2248 }
 0x51c   : >> { %2621 = vrsqrt.f32 %v2253_v59  ;;  %v2252_v50 = vmul.f32 0.0051020407, %v2249_v22 }
 0x51e   : >> { %v2255_v44 = vadd.f32 0.001, %v2252_v50 }
 0x520   : >> { %2623 = vrsqrt.f32 %v2255_v44 }
 0x523   : >> { %v2620_v15 = vpop.eup %2619 }
 0x524   : >> { %v2260_v21 = vmul.f32 %v2620_v15, %v429_v39 }
 0x526   : >> { %v2622_v58 = vpop.eup %2621  ;;  %2269 = vperm.xlu0 %2612, %v2260_v21  }
 0x527   : >> { %v2259_v41 = vmul.f32 %v2622_v58, %v428_v47 }
 0x529   : >> { %2264 = vperm.xlu1 %2611, %v2259_v41  }
 0x52a   : >> { %v2624_v35 = vpop.eup %2623 }
 0x52b   : >> { %v2261_v6 = vmul.f32 %v2624_v35, %v430_v19 }
 0x52d   : >> { %2285 = vperm.xlu1 %2611, %v432_v31  }
 0x531   : >> { %2290 = vperm.xlu1 %2611, %v433_v23  }
 0x535   : >> { %2274 = vperm.xlu1 %2611, %v2261_v6  }
 0x539   : >> { %2295 = vperm.xlu1 %2611, %v434_v54  }
 0x5a5   : >> { %v2270_v29 = vpop.permute.xlu0 %2269 }
 0x5a6   : >> { %v2279_v10 = vmul.f32 %v2270_v29, %v4228_v36  ;;  %v2280_v18 = vmul.f32 %v2270_v29, %v4230_v51 }
 0x5a8   : >> { %v2265_v1 = vpop.permute.xlu1 %2264 }
 0x5a9   : >> { %v2277_v0 = vmul.f32 %v2265_v1, %v2226_v28  ;;  %v2278_v11 = vmul.f32 %v2265_v1, %v2227_v56 }
 0x5ac   : >> { %v2286_v12 = vpop.permute.xlu1 %2285 }
 0x5ad   : >> { %v2298_v60 = vadd.f32 %v2286_v12, %v2277_v0  ;;  %v2299_v38 = vadd.f32 %v2286_v12, %v2278_v11 }
 0x5af   : >> { %2306 = vst [vmem:[%s2305_s27] sm:$0xff] %v2298_v60  ;;  %2307 = vst.msk [vmem:[%s2305_s27 + $0x8] sm:$0xff] %vm435_vm0, %v2299_v38 }
 0x5b0   : >> { %v2291_v49 = vpop.permute.xlu1 %2290 }
 0x5b1   : >> { %v2300_v57 = vadd.f32 %v2291_v49, %v2279_v10  ;;  %v2301_v27 = vadd.f32 %v2291_v49, %v2280_v18 }
 0x5b3   : >> { %2308 = vst [vmem:[%s2305_s27 + $0x10] sm:$0xff] %v2300_v57  ;;  %2309 = vst.msk [vmem:[%s2305_s27 + $0x18] sm:$0xff] %vm435_vm0, %v2301_v27 }
 0x5b4   : >> { %v2275_v24 = vpop.permute.xlu1 %2274 }
 0x5b5   : >> { %v2281_v5 = vmul.f32 %v2275_v24, %v2230_v7  ;;  %v2282_v4 = vmul.f32 %v2275_v24, %v2231_v52  ;;  %401 = sbr.rel (!%p399_p4) target bundleno = 18 (0x12), region = 130 }
 0x5b8   : >> { %v2296_v2 = vpop.permute.xlu1 %2295 }
 0x5b9   : >> { %v2302_v62 = vadd.f32 %v2296_v2, %v2281_v5  ;;  %v2303_v3 = vadd.f32 %v2296_v2, %v2282_v4 }
 0x5bb   : >> { %2310 = vst [vmem:[%s2305_s27 + $0x20] sm:$0xff] %v2302_v62  ;;  %2311 = vst.msk [vmem:[%s2305_s27 + $0x28] sm:$0xff] %vm435_vm0, %v2303_v3 }
 0x5bc PF: > { %s17_s24 = sadd.s32 1, %s2638_s24  }
 0x5bd   : > { %p14_p5 = scmp.ge.s32.totalorder %s17_s24, 4  }
 0x5bf   :  { %16 = sbr.rel (!%p14_p5) target bundleno = 1 (0x1), region = 141 }

</bundles_post_ra>
